<compile_context>
chip_gen: v6e
topology: v6e:2x2x1
jax: 0.10.0
libtpu: 0.0.40
codegen_flags: <defaults>
</compile_context>

<pallas_src>
from functools import partial

import jax
import jax.numpy as jnp
from jax.experimental import pallas as pl
from jax.experimental.pallas import tpu as pltpu

_EPS = 1e-5
_VMEM_LIMIT = 32 * 1024 * 1024  # explicit scoped-VMEM budget (safe on v5e/v6e/v7x)


# ---------------------------------------------------------------------------
# Fused kernel: the whole residual block in one call
# ---------------------------------------------------------------------------
def _residual_block_kernel(x_ref, w1_ref, w2_ref, fold_ref, bn_ref, o_ref,
                           *, H, W, mm_dtype):
    """Whole batch resident in VMEM.

    x_ref   : (N*H, W*C)   input rows, lane axis = W*C
    w1_ref  : (3, W*C, W*C) banded conv1 weight, leading axis = dy tap
    w2_ref  : (3, W*C, W*C) banded conv2 weight
    fold_ref: (W*C, W*C)   0/1 channel-fold matrix (sums lanes with same C)
    bn_ref  : (4, W*C)     [gamma1, beta1, gamma2, beta2] tiled over W
    o_ref   : (N*H, W*C)   output rows
    """
    x = x_ref[...]                                   # (NH, WC) f32
    NH, WC = x.shape
    fold = fold_ref[...]
    bn = bn_ref[...]
    g1, b1, g2, b2 = bn[0:1], bn[1:2], bn[2:3], bn[3:4]
    inv_cnt = 1.0 / float(NH * W)                    # 1 / (N*H*W)

    # Per-image H-boundary masks for the stacked batch (zero padding fused).
    row = jax.lax.broadcasted_iota(jnp.int32, (NH, 1), 0)
    not_first = (row % H) != 0                       # row h-1 exists in same image
    not_last = (row % H) != (H - 1)                  # row h+1 exists in same image

    zero_row = jnp.zeros((1, WC), jnp.float32)

    def conv3x3(a, w_ref):
        # dy = -1 / 0 / +1 row shifts over the stacked batch; image-boundary
        # rows zeroed by the masks.  Three accumulated MXU matmuls, M = N*H.
        a_up = jnp.where(not_first,
                         jnp.concatenate([zero_row, a[:-1, :]], axis=0), 0.0)
        a_dn = jnp.where(not_last,
                         jnp.concatenate([a[1:, :], zero_row], axis=0), 0.0)
        acc = jnp.dot(a_up.astype(mm_dtype), w_ref[0],
                      preferred_element_type=jnp.float32)
        acc += jnp.dot(a.astype(mm_dtype), w_ref[1],
                       preferred_element_type=jnp.float32)
        acc += jnp.dot(a_dn.astype(mm_dtype), w_ref[2],
                       preferred_element_type=jnp.float32)
        return acc                                   # (NH, WC) f32

    def bn_scale_shift(y, gamma_t, beta_t):
        # Exact two-pass batch statistics, fully in VMEM.
        # W->C fold via a tiny (1, WC)@(WC, WC) matmul (per-channel, tiled over W).
        mean = jnp.dot(jnp.sum(y, axis=0, keepdims=True), fold,
                       preferred_element_type=jnp.float32) * inv_cnt
        c = y - mean
        var = jnp.dot(jnp.sum(c * c, axis=0, keepdims=True), fold,
                      preferred_element_type=jnp.float32) * inv_cnt
        scale = gamma_t * jax.lax.rsqrt(var + _EPS)
        shift = beta_t - mean * scale
        return scale, shift

    # Phase 1: conv1 + BN1 stats.
    y1 = conv3x3(x, w1_ref)
    s1, t1 = bn_scale_shift(y1, g1, b1)

    # Phase 2: BN1 affine + ReLU + conv2 + BN2 stats.
    a1 = jnp.maximum(y1 * s1 + t1, 0.0)
    y2 = conv3x3(a1, w2_ref)
    s2, t2 = bn_scale_shift(y2, g2, b2)

    # Phase 3: BN2 affine + residual add + ReLU (lane-dense elementwise).
    o_ref[...] = jnp.maximum(y2 * s2 + t2 + x, 0.0).astype(o_ref.dtype)


# ---------------------------------------------------------------------------
# Wrapper helpers
# ---------------------------------------------------------------------------
def _expand_conv_weight(w_oihw, W, dtype):
    """OIHW 3x3 weight -> (3, W*Cin, W*Cout) banded matmul weight (one slab per dy).

    Within a slab, row = w_in*Cin + ci, col = w_out*Cout + co; the (w_in, w_out)
    block is K[dy, w_in - w_out + 1] when |w_in - w_out| <= 1, else 0 (encodes
    the dx taps and the zero W-padding).
    """
    K = jnp.transpose(w_oihw, (2, 3, 1, 0)).astype(jnp.float32)   # (kh, kw, Cin, Cout)
    Cin, Cout = K.shape[2], K.shape[3]
    wi = jnp.arange(W)[:, None]
    wo = jnp.arange(W)[None, :]
    d = wi - wo                                                   # (W, W)
    kx = jnp.clip(d + 1, 0, 2)
    valid = (jnp.abs(d) <= 1).astype(jnp.float32)[:, :, None, None]
    slabs = []
    for kh in range(3):
        blk = K[kh][kx] * valid                                   # (W, W, Cin, Cout)
        slabs.append(jnp.transpose(blk, (0, 2, 1, 3)).reshape(W * Cin, W * Cout))
    return jnp.stack(slabs, axis=0).astype(dtype)                 # (3, W*Cin, W*Cout)


def _fold_matrix(W, C):
    """(W*C, W*C) 0/1 matrix: stats @ F sums lanes sharing a channel (W -> C fold)."""
    lane = jnp.arange(W * C)
    return (lane[:, None] % C == lane[None, :] % C).astype(jnp.float32)


# ---------------------------------------------------------------------------
# Public entry point (PyTorch NCHW interface)
# ---------------------------------------------------------------------------
@partial(jax.jit, static_argnames=("use_bf16_matmul",))
def residual_block(x_nchw, w1_oihw, w2_oihw, gamma1, beta1, gamma2, beta2,
                   use_bf16_matmul=False):
    """ResidualBlock forward (PyTorch training-mode BN semantics)."""
    N, C, H, W = x_nchw.shape
    WC = W * C
    NH = N * H

    # Layout glue only (PyTorch hands us NCHW): lane axis becomes W*C,
    # the batch is stacked into the sublane (row) axis.
    x = jnp.transpose(x_nchw, (0, 2, 3, 1)).reshape(NH, WC).astype(jnp.float32)

    mm_dtype = jnp.bfloat16 if use_bf16_matmul else jnp.float32
    w1b = _expand_conv_weight(w1_oihw, W, mm_dtype)
    w2b = _expand_conv_weight(w2_oihw, W, mm_dtype)
    fold = _fold_matrix(W, C)
    bn = jnp.stack([jnp.tile(gamma1.astype(jnp.float32), W),
                    jnp.tile(beta1.astype(jnp.float32), W),
                    jnp.tile(gamma2.astype(jnp.float32), W),
                    jnp.tile(beta2.astype(jnp.float32), W)], axis=0)   # (4, WC)

    kernel = partial(_residual_block_kernel, H=H, W=W, mm_dtype=mm_dtype)
    out = pl.pallas_call(
        kernel,
        grid=(1,),
        in_specs=[
            pl.BlockSpec((NH, WC), lambda i: (0, 0)),
            pl.BlockSpec((3, WC, WC), lambda i: (0, 0, 0)),
            pl.BlockSpec((3, WC, WC), lambda i: (0, 0, 0)),
            pl.BlockSpec((WC, WC), lambda i: (0, 0)),
            pl.BlockSpec((4, WC), lambda i: (0, 0)),
        ],
        out_specs=pl.BlockSpec((NH, WC), lambda i: (0, 0)),
        out_shape=jax.ShapeDtypeStruct((NH, WC), jnp.float32),
        compiler_params=pltpu.CompilerParams(
            dimension_semantics=("arbitrary",),
            vmem_limit_bytes=_VMEM_LIMIT,
        ),
    )(x, w1b, w2b, fold, bn)

    out_nhwc = out.reshape(N, H, W, C)
    return jnp.transpose(out_nhwc, (0, 3, 1, 2)).astype(x_nchw.dtype)


# ---------------------------------------------------------------------------
# Pure-JAX reference (matches PyTorch training-mode forward)
# ---------------------------------------------------------------------------
def residual_block_ref(x_nchw, w1, w2, g1, b1, g2, b2):
    def conv(x, w):
        return jax.lax.conv_general_dilated(
            x, w, window_strides=(1, 1), padding="SAME",
            dimension_numbers=("NCHW", "OIHW", "NCHW"))

    def bn(x, g, b):
        mean = jnp.mean(x, axis=(0, 2, 3), keepdims=True)
        var = jnp.mean((x - mean) ** 2, axis=(0, 2, 3), keepdims=True)
        return ((x - mean) * jax.lax.rsqrt(var + _EPS)
                * g.reshape(1, -1, 1, 1) + b.reshape(1, -1, 1, 1))

    out = jax.nn.relu(bn(conv(x_nchw, w1), g1, b1))
    out = bn(conv(out, w2), g2, b2)
    return jax.nn.relu(out + x_nchw)


if __name__ == "__main__":
    N, C, H, W = 2, 8, 16, 16   # W*C = 128 -> exactly one vreg lane width
    key = jax.random.PRNGKey(0)
    kx, k1, k2, k3, k4, k5, k6 = jax.random.split(key, 7)

    x = jax.random.normal(kx, (N, C, H, W), jnp.float32)
    w1 = 0.1 * jax.random.normal(k1, (C, C, 3, 3), jnp.float32)
    w2 = 0.1 * jax.random.normal(k2, (C, C, 3, 3), jnp.float32)
    gamma1 = 1.0 + 0.1 * jax.random.normal(k3, (C,), jnp.float32)
    beta1 = 0.1 * jax.random.normal(k4, (C,), jnp.float32)
    gamma2 = 1.0 + 0.1 * jax.random.normal(k5, (C,), jnp.float32)
    beta2 = 0.1 * jax.random.normal(k6, (C,), jnp.float32)

    out = residual_block(x, w1, w2, gamma1, beta1, gamma2, beta2)
    jax.block_until_ready(out)

    ref = residual_block_ref(x, w1, w2, gamma1, beta1, gamma2, beta2)
    err = float(jnp.max(jnp.abs(out - ref)))
    assert jnp.allclose(out, ref, atol=1e-4, rtol=1e-4), f"max abs err = {err}"
    print("KERNEL_OK")
</pallas_src>

<mosaic_0001>
module attributes {stable_mosaic.version = 11 : i64} {
  func.func @_residual_block_kernel(%arg0: i32, %arg1: memref<32x128xf32, #tpu.memory_space<vmem>>, %arg2: memref<3x128x128xf32, #tpu.memory_space<vmem>>, %arg3: memref<3x128x128xf32, #tpu.memory_space<vmem>>, %arg4: memref<128x128xf32, #tpu.memory_space<vmem>>, %arg5: memref<4x128xf32, #tpu.memory_space<vmem>>, %arg6: memref<32x128xf32, #tpu.memory_space<vmem>>) attributes {dimension_semantics = [#tpu.dimension_semantics<arbitrary>], iteration_bounds = array<i64: 1>, scalar_prefetch = 0 : i64, scratch_operands = 0 : i64, tpu.core_type = #tpu.core_type<tc>, window_params = [{pipeline_mode = #tpu.pipeline_mode<synchronous>, transform_indices = @transform_0, window_bounds = array<i64: 32, 128>}, {pipeline_mode = #tpu.pipeline_mode<synchronous>, transform_indices = @transform_1, window_bounds = array<i64: 3, 128, 128>}, {pipeline_mode = #tpu.pipeline_mode<synchronous>, transform_indices = @transform_2, window_bounds = array<i64: 3, 128, 128>}, {pipeline_mode = #tpu.pipeline_mode<synchronous>, transform_indices = @transform_3, window_bounds = array<i64: 128, 128>}, {pipeline_mode = #tpu.pipeline_mode<synchronous>, transform_indices = @transform_4, window_bounds = array<i64: 4, 128>}, {pipeline_mode = #tpu.pipeline_mode<synchronous>, transform_indices = @transform_5, window_bounds = array<i64: 32, 128>}]} {
    %c0 = arith.constant 0 : index
    %c0_0 = arith.constant 0 : index
    %0 = vector.load %arg1[%c0, %c0_0] : memref<32x128xf32, #tpu.memory_space<vmem>>, vector<32x128xf32>
    %c0_1 = arith.constant 0 : index
    %c0_2 = arith.constant 0 : index
    %1 = vector.load %arg4[%c0_1, %c0_2] : memref<128x128xf32, #tpu.memory_space<vmem>>, vector<128x128xf32>
    %c0_3 = arith.constant 0 : index
    %c0_4 = arith.constant 0 : index
    %2 = vector.load %arg5[%c0_3, %c0_4] : memref<4x128xf32, #tpu.memory_space<vmem>>, vector<4x128xf32>
    %3 = vector.extract_strided_slice %2 {offsets = [0, 0], sizes = [1, 128], strides = [1, 1]} : vector<4x128xf32> to vector<1x128xf32>
    %4 = vector.extract_strided_slice %2 {offsets = [1, 0], sizes = [1, 128], strides = [1, 1]} : vector<4x128xf32> to vector<1x128xf32>
    %5 = vector.extract_strided_slice %2 {offsets = [2, 0], sizes = [1, 128], strides = [1, 1]} : vector<4x128xf32> to vector<1x128xf32>
    %6 = vector.extract_strided_slice %2 {offsets = [3, 0], sizes = [1, 128], strides = [1, 1]} : vector<4x128xf32> to vector<1x128xf32>
    %7 = tpu.iota {dimensions = array<i32: 0>} : vector<32x1xi32>
    %c16_i32 = arith.constant 16 : i32
    %c0_i32 = arith.constant 0 : i32
    %8 = arith.cmpi eq, %c16_i32, %c0_i32 : i32
    %c1_i32 = arith.constant 1 : i32
    %9 = arith.select %8, %c1_i32, %c16_i32 : i32
    %10 = vector.broadcast %9 : i32 to vector<32x1xi32>
    %11 = arith.remsi %7, %10 : vector<32x1xi32>
    %c0_i32_5 = arith.constant 0 : i32
    %12 = vector.broadcast %c0_i32_5 : i32 to vector<32x1xi32>
    %13 = arith.cmpi ne, %11, %12 : vector<32x1xi32>
    %c0_i32_6 = arith.constant 0 : i32
    %14 = vector.broadcast %c0_i32_6 : i32 to vector<32x1xi32>
    %15 = arith.cmpi slt, %11, %14 : vector<32x1xi32>
    %c0_i32_7 = arith.constant 0 : i32
    %16 = arith.cmpi slt, %9, %c0_i32_7 : i32
    %17 = vector.broadcast %16 : i1 to vector<32x1xi1>
    %18 = vector.broadcast %17 : vector<32x1xi1> to vector<32x1xi1>
    %19 = arith.xori %15, %18 : vector<32x1xi1>
    %20 = arith.andi %19, %13 : vector<32x1xi1>
    %21 = vector.broadcast %9 : i32 to vector<32x1xi32>
    %22 = arith.addi %11, %21 : vector<32x1xi32>
    %23 = arith.select %20, %22, %11 : vector<32x1xi1>, vector<32x1xi32>
    %c0_i32_8 = arith.constant 0 : i32
    %24 = vector.broadcast %c0_i32_8 : i32 to vector<32x1xi32>
    %25 = arith.cmpi ne, %23, %24 : vector<32x1xi32>
    %c16_i32_9 = arith.constant 16 : i32
    %c0_i32_10 = arith.constant 0 : i32
    %26 = arith.cmpi eq, %c16_i32_9, %c0_i32_10 : i32
    %c1_i32_11 = arith.constant 1 : i32
    %27 = arith.select %26, %c1_i32_11, %c16_i32_9 : i32
    %28 = vector.broadcast %27 : i32 to vector<32x1xi32>
    %29 = arith.remsi %7, %28 : vector<32x1xi32>
    %c0_i32_12 = arith.constant 0 : i32
    %30 = vector.broadcast %c0_i32_12 : i32 to vector<32x1xi32>
    %31 = arith.cmpi ne, %29, %30 : vector<32x1xi32>
    %c0_i32_13 = arith.constant 0 : i32
    %32 = vector.broadcast %c0_i32_13 : i32 to vector<32x1xi32>
    %33 = arith.cmpi slt, %29, %32 : vector<32x1xi32>
    %c0_i32_14 = arith.constant 0 : i32
    %34 = arith.cmpi slt, %27, %c0_i32_14 : i32
    %35 = vector.broadcast %34 : i1 to vector<32x1xi1>
    %36 = vector.broadcast %35 : vector<32x1xi1> to vector<32x1xi1>
    %37 = arith.xori %33, %36 : vector<32x1xi1>
    %38 = arith.andi %37, %31 : vector<32x1xi1>
    %39 = vector.broadcast %27 : i32 to vector<32x1xi32>
    %40 = arith.addi %29, %39 : vector<32x1xi32>
    %41 = arith.select %38, %40, %29 : vector<32x1xi1>, vector<32x1xi32>
    %c15_i32 = arith.constant 15 : i32
    %42 = vector.broadcast %c15_i32 : i32 to vector<32x1xi32>
    %43 = arith.cmpi ne, %41, %42 : vector<32x1xi32>
    %cst = arith.constant 0.000000e+00 : f32
    %44 = vector.broadcast %cst : f32 to vector<1x128xf32>
    %45 = vector.extract_strided_slice %0 {offsets = [0, 0], sizes = [31, 128], strides = [1, 1]} : vector<32x128xf32> to vector<31x128xf32>
    %46 = tpu.concatenate %44, %45 in 0 : vector<1x128xf32>, vector<31x128xf32> -> vector<32x128xf32>
    %cst_15 = arith.constant 0.000000e+00 : f32
    %47 = vector.shape_cast %25 : vector<32x1xi1> to vector<32x1xi1>
    %48 = vector.broadcast %47 : vector<32x1xi1> to vector<32x128xi1>
    %49 = vector.broadcast %cst_15 : f32 to vector<32x128xf32>
    %50 = arith.select %48, %46, %49 : vector<32x128xi1>, vector<32x128xf32>
    %51 = vector.extract_strided_slice %0 {offsets = [1, 0], sizes = [31, 128], strides = [1, 1]} : vector<32x128xf32> to vector<31x128xf32>
    %52 = tpu.concatenate %51, %44 in 0 : vector<31x128xf32>, vector<1x128xf32> -> vector<32x128xf32>
    %cst_16 = arith.constant 0.000000e+00 : f32
    %53 = vector.shape_cast %43 : vector<32x1xi1> to vector<32x1xi1>
    %54 = vector.broadcast %53 : vector<32x1xi1> to vector<32x128xi1>
    %55 = vector.broadcast %cst_16 : f32 to vector<32x128xf32>
    %56 = arith.select %54, %52, %55 : vector<32x128xi1>, vector<32x128xf32>
    %c0_17 = arith.constant 0 : index
    %c0_18 = arith.constant 0 : index
    %c0_19 = arith.constant 0 : index
    %57 = vector.load %arg2[%c0_17, %c0_18, %c0_19] : memref<3x128x128xf32, #tpu.memory_space<vmem>>, vector<1x128x128xf32>
    %58 = vector.shape_cast %57 : vector<1x128x128xf32> to vector<128x128xf32>
    %cst_20 = arith.constant dense<0.000000e+00> : vector<32x128xf32>
    %59 = tpu.matmul %50, %58, %cst_20 {dimension_numbers = #tpu.dot_dimension_numbers<[1], [0], [0], [1], [0, 0, 1, 1], [], []>} : vector<32x128xf32>, vector<128x128xf32>, vector<32x128xf32> -> vector<32x128xf32>
    %c1 = arith.constant 1 : index
    %c0_21 = arith.constant 0 : index
    %c0_22 = arith.constant 0 : index
    %60 = vector.load %arg2[%c1, %c0_21, %c0_22] : memref<3x128x128xf32, #tpu.memory_space<vmem>>, vector<1x128x128xf32>
    %61 = vector.shape_cast %60 : vector<1x128x128xf32> to vector<128x128xf32>
    %cst_23 = arith.constant dense<0.000000e+00> : vector<32x128xf32>
    %62 = tpu.matmul %0, %61, %cst_23 {dimension_numbers = #tpu.dot_dimension_numbers<[1], [0], [0], [1], [0, 0, 1, 1], [], []>} : vector<32x128xf32>, vector<128x128xf32>, vector<32x128xf32> -> vector<32x128xf32>
    %63 = arith.addf %59, %62 : vector<32x128xf32>
    %c2 = arith.constant 2 : index
    %c0_24 = arith.constant 0 : index
    %c0_25 = arith.constant 0 : index
    %64 = vector.load %arg2[%c2, %c0_24, %c0_25] : memref<3x128x128xf32, #tpu.memory_space<vmem>>, vector<1x128x128xf32>
    %65 = vector.shape_cast %64 : vector<1x128x128xf32> to vector<128x128xf32>
    %cst_26 = arith.constant dense<0.000000e+00> : vector<32x128xf32>
    %66 = tpu.matmul %56, %65, %cst_26 {dimension_numbers = #tpu.dot_dimension_numbers<[1], [0], [0], [1], [0, 0, 1, 1], [], []>} : vector<32x128xf32>, vector<128x128xf32>, vector<32x128xf32> -> vector<32x128xf32>
    %67 = arith.addf %63, %66 : vector<32x128xf32>
    %cst_27 = arith.constant dense<0.000000e+00> : vector<128xf32>
    %68 = vector.multi_reduction <add>, %67, %cst_27 [0] : vector<32x128xf32> to vector<128xf32>
    %69 = vector.shape_cast %68 : vector<128xf32> to vector<1x128xf32>
    %cst_28 = arith.constant dense<0.000000e+00> : vector<1x128xf32>
    %70 = tpu.matmul %69, %1, %cst_28 {dimension_numbers = #tpu.dot_dimension_numbers<[1], [0], [0], [1], [0, 0, 1, 1], [], []>} : vector<1x128xf32>, vector<128x128xf32>, vector<1x128xf32> -> vector<1x128xf32>
    %cst_29 = arith.constant 0.001953125 : f32
    %71 = vector.broadcast %cst_29 : f32 to vector<1x128xf32>
    %72 = arith.mulf %70, %71 : vector<1x128xf32>
    %73 = vector.broadcast %72 : vector<1x128xf32> to vector<32x128xf32>
    %74 = arith.subf %67, %73 : vector<32x128xf32>
    %75 = arith.mulf %74, %74 : vector<32x128xf32>
    %cst_30 = arith.constant dense<0.000000e+00> : vector<128xf32>
    %76 = vector.multi_reduction <add>, %75, %cst_30 [0] : vector<32x128xf32> to vector<128xf32>
    %77 = vector.shape_cast %76 : vector<128xf32> to vector<1x128xf32>
    %cst_31 = arith.constant dense<0.000000e+00> : vector<1x128xf32>
    %78 = tpu.matmul %77, %1, %cst_31 {dimension_numbers = #tpu.dot_dimension_numbers<[1], [0], [0], [1], [0, 0, 1, 1], [], []>} : vector<1x128xf32>, vector<128x128xf32>, vector<1x128xf32> -> vector<1x128xf32>
    %cst_32 = arith.constant 0.001953125 : f32
    %79 = vector.broadcast %cst_32 : f32 to vector<1x128xf32>
    %80 = arith.mulf %78, %79 : vector<1x128xf32>
    %cst_33 = arith.constant 9.99999974E-6 : f32
    %81 = vector.broadcast %cst_33 : f32 to vector<1x128xf32>
    %82 = arith.addf %80, %81 : vector<1x128xf32>
    %83 = math.rsqrt %82 : vector<1x128xf32>
    %84 = arith.mulf %3, %83 : vector<1x128xf32>
    %85 = arith.mulf %72, %84 : vector<1x128xf32>
    %86 = arith.subf %4, %85 : vector<1x128xf32>
    %87 = vector.broadcast %84 : vector<1x128xf32> to vector<32x128xf32>
    %88 = arith.mulf %67, %87 : vector<32x128xf32>
    %89 = vector.broadcast %86 : vector<1x128xf32> to vector<32x128xf32>
    %90 = arith.addf %88, %89 : vector<32x128xf32>
    %cst_34 = arith.constant 0.000000e+00 : f32
    %91 = vector.broadcast %cst_34 : f32 to vector<32x128xf32>
    %92 = arith.maximumf %90, %91 : vector<32x128xf32>
    %93 = vector.extract_strided_slice %92 {offsets = [0, 0], sizes = [31, 128], strides = [1, 1]} : vector<32x128xf32> to vector<31x128xf32>
    %94 = tpu.concatenate %44, %93 in 0 : vector<1x128xf32>, vector<31x128xf32> -> vector<32x128xf32>
    %cst_35 = arith.constant 0.000000e+00 : f32
    %95 = vector.shape_cast %25 : vector<32x1xi1> to vector<32x1xi1>
    %96 = vector.broadcast %95 : vector<32x1xi1> to vector<32x128xi1>
    %97 = vector.broadcast %cst_35 : f32 to vector<32x128xf32>
    %98 = arith.select %96, %94, %97 : vector<32x128xi1>, vector<32x128xf32>
    %99 = vector.extract_strided_slice %92 {offsets = [1, 0], sizes = [31, 128], strides = [1, 1]} : vector<32x128xf32> to vector<31x128xf32>
    %100 = tpu.concatenate %99, %44 in 0 : vector<31x128xf32>, vector<1x128xf32> -> vector<32x128xf32>
    %cst_36 = arith.constant 0.000000e+00 : f32
    %101 = vector.shape_cast %43 : vector<32x1xi1> to vector<32x1xi1>
    %102 = vector.broadcast %101 : vector<32x1xi1> to vector<32x128xi1>
    %103 = vector.broadcast %cst_36 : f32 to vector<32x128xf32>
    %104 = arith.select %102, %100, %103 : vector<32x128xi1>, vector<32x128xf32>
    %c0_37 = arith.constant 0 : index
    %c0_38 = arith.constant 0 : index
    %c0_39 = arith.constant 0 : index
    %105 = vector.load %arg3[%c0_37, %c0_38, %c0_39] : memref<3x128x128xf32, #tpu.memory_space<vmem>>, vector<1x128x128xf32>
    %106 = vector.shape_cast %105 : vector<1x128x128xf32> to vector<128x128xf32>
    %cst_40 = arith.constant dense<0.000000e+00> : vector<32x128xf32>
    %107 = tpu.matmul %98, %106, %cst_40 {dimension_numbers = #tpu.dot_dimension_numbers<[1], [0], [0], [1], [0, 0, 1, 1], [], []>} : vector<32x128xf32>, vector<128x128xf32>, vector<32x128xf32> -> vector<32x128xf32>
    %c1_41 = arith.constant 1 : index
    %c0_42 = arith.constant 0 : index
    %c0_43 = arith.constant 0 : index
    %108 = vector.load %arg3[%c1_41, %c0_42, %c0_43] : memref<3x128x128xf32, #tpu.memory_space<vmem>>, vector<1x128x128xf32>
    %109 = vector.shape_cast %108 : vector<1x128x128xf32> to vector<128x128xf32>
    %cst_44 = arith.constant dense<0.000000e+00> : vector<32x128xf32>
    %110 = tpu.matmul %92, %109, %cst_44 {dimension_numbers = #tpu.dot_dimension_numbers<[1], [0], [0], [1], [0, 0, 1, 1], [], []>} : vector<32x128xf32>, vector<128x128xf32>, vector<32x128xf32> -> vector<32x128xf32>
    %111 = arith.addf %107, %110 : vector<32x128xf32>
    %c2_45 = arith.constant 2 : index
    %c0_46 = arith.constant 0 : index
    %c0_47 = arith.constant 0 : index
    %112 = vector.load %arg3[%c2_45, %c0_46, %c0_47] : memref<3x128x128xf32, #tpu.memory_space<vmem>>, vector<1x128x128xf32>
    %113 = vector.shape_cast %112 : vector<1x128x128xf32> to vector<128x128xf32>
    %cst_48 = arith.constant dense<0.000000e+00> : vector<32x128xf32>
    %114 = tpu.matmul %104, %113, %cst_48 {dimension_numbers = #tpu.dot_dimension_numbers<[1], [0], [0], [1], [0, 0, 1, 1], [], []>} : vector<32x128xf32>, vector<128x128xf32>, vector<32x128xf32> -> vector<32x128xf32>
    %115 = arith.addf %111, %114 : vector<32x128xf32>
    %cst_49 = arith.constant dense<0.000000e+00> : vector<128xf32>
    %116 = vector.multi_reduction <add>, %115, %cst_49 [0] : vector<32x128xf32> to vector<128xf32>
    %117 = vector.shape_cast %116 : vector<128xf32> to vector<1x128xf32>
    %cst_50 = arith.constant dense<0.000000e+00> : vector<1x128xf32>
    %118 = tpu.matmul %117, %1, %cst_50 {dimension_numbers = #tpu.dot_dimension_numbers<[1], [0], [0], [1], [0, 0, 1, 1], [], []>} : vector<1x128xf32>, vector<128x128xf32>, vector<1x128xf32> -> vector<1x128xf32>
    %cst_51 = arith.constant 0.001953125 : f32
    %119 = vector.broadcast %cst_51 : f32 to vector<1x128xf32>
    %120 = arith.mulf %118, %119 : vector<1x128xf32>
    %121 = vector.broadcast %120 : vector<1x128xf32> to vector<32x128xf32>
    %122 = arith.subf %115, %121 : vector<32x128xf32>
    %123 = arith.mulf %122, %122 : vector<32x128xf32>
    %cst_52 = arith.constant dense<0.000000e+00> : vector<128xf32>
    %124 = vector.multi_reduction <add>, %123, %cst_52 [0] : vector<32x128xf32> to vector<128xf32>
    %125 = vector.shape_cast %124 : vector<128xf32> to vector<1x128xf32>
    %cst_53 = arith.constant dense<0.000000e+00> : vector<1x128xf32>
    %126 = tpu.matmul %125, %1, %cst_53 {dimension_numbers = #tpu.dot_dimension_numbers<[1], [0], [0], [1], [0, 0, 1, 1], [], []>} : vector<1x128xf32>, vector<128x128xf32>, vector<1x128xf32> -> vector<1x128xf32>
    %cst_54 = arith.constant 0.001953125 : f32
    %127 = vector.broadcast %cst_54 : f32 to vector<1x128xf32>
    %128 = arith.mulf %126, %127 : vector<1x128xf32>
    %cst_55 = arith.constant 9.99999974E-6 : f32
    %129 = vector.broadcast %cst_55 : f32 to vector<1x128xf32>
    %130 = arith.addf %128, %129 : vector<1x128xf32>
    %131 = math.rsqrt %130 : vector<1x128xf32>
    %132 = arith.mulf %5, %131 : vector<1x128xf32>
    %133 = arith.mulf %120, %132 : vector<1x128xf32>
    %134 = arith.subf %6, %133 : vector<1x128xf32>
    %135 = vector.broadcast %132 : vector<1x128xf32> to vector<32x128xf32>
    %136 = arith.mulf %115, %135 : vector<32x128xf32>
    %137 = vector.broadcast %134 : vector<1x128xf32> to vector<32x128xf32>
    %138 = arith.addf %136, %137 : vector<32x128xf32>
    %139 = arith.addf %138, %0 : vector<32x128xf32>
    %cst_56 = arith.constant 0.000000e+00 : f32
    %140 = vector.broadcast %cst_56 : f32 to vector<32x128xf32>
    %141 = arith.maximumf %139, %140 : vector<32x128xf32>
    %c0_57 = arith.constant 0 : index
    %c0_58 = arith.constant 0 : index
    %142 = vector.load %arg6[%c0_57, %c0_58] : memref<32x128xf32, #tpu.memory_space<vmem>>, vector<32x128xf32>
    tpu.vector_store %arg6[%c0_57, %c0_58], %141 {strides = array<i32>} : memref<32x128xf32, #tpu.memory_space<vmem>>, vector<32x128xf32>,
    return
  }
  func.func @transform_0(%arg0: i32) -> (i32, i32) {
    %c0_i32 = arith.constant 0 : i32
    %c0_i32_0 = arith.constant 0 : i32
    %c0_i32_1 = arith.constant 0 : i32
    return %c0_i32, %c0_i32_0 : i32, i32
  }
  func.func @transform_1(%arg0: i32) -> (i32, i32, i32) {
    %c0_i32 = arith.constant 0 : i32
    %c0_i32_0 = arith.constant 0 : i32
    %c0_i32_1 = arith.constant 0 : i32
    %c0_i32_2 = arith.constant 0 : i32
    return %c0_i32, %c0_i32_0, %c0_i32_1 : i32, i32, i32
  }
  func.func @transform_2(%arg0: i32) -> (i32, i32, i32) {
    %c0_i32 = arith.constant 0 : i32
    %c0_i32_0 = arith.constant 0 : i32
    %c0_i32_1 = arith.constant 0 : i32
    %c0_i32_2 = arith.constant 0 : i32
    return %c0_i32, %c0_i32_0, %c0_i32_1 : i32, i32, i32
  }
  func.func @transform_3(%arg0: i32) -> (i32, i32) {
    %c0_i32 = arith.constant 0 : i32
    %c0_i32_0 = arith.constant 0 : i32
    %c0_i32_1 = arith.constant 0 : i32
    return %c0_i32, %c0_i32_0 : i32, i32
  }
  func.func @transform_4(%arg0: i32) -> (i32, i32) {
    %c0_i32 = arith.constant 0 : i32
    %c0_i32_0 = arith.constant 0 : i32
    %c0_i32_1 = arith.constant 0 : i32
    return %c0_i32, %c0_i32_0 : i32, i32
  }
  func.func @transform_5(%arg0: i32) -> (i32, i32) {
    %c0_i32 = arith.constant 0 : i32
    %c0_i32_0 = arith.constant 0 : i32
    %c0_i32_1 = arith.constant 0 : i32
    return %c0_i32, %c0_i32_0 : i32, i32
  }
}

</mosaic_0001>

<bundles_post_ra>
// kernel: tile.23
= control target key start
LH: loop header
LB: loop body
LE: loop exit
PB: predicated region body
PF: predicated region fallthrough
CT: control target
= control target key end

     0   :  { %s28_s0 = inlined_call_operand.vmem [shape: f32[8], index: 0, kind: input, shape index: {}]   ;;  %s29_s1 = inlined_call_operand.vmem [shape: f32[16,8], index: 1, kind: output, shape index: {}]  }
   0x1   :  { %v4_v0 = vld [vmem:[%s28_s0] ss:$0 sm:$0xff] }
   0x2   :  { %5 = vst [vmem:[%s29_s1] sm:$0xff] %v4_v0  ;;  %8 = vst [vmem:[%s29_s1 + $0x8] sm:$0xff] %v4_v0 }

// kernel: tile.36
= control target key start
LH: loop header
LB: loop body
LE: loop exit
PB: predicated region body
PF: predicated region fallthrough
CT: control target
= control target key end

     0   :  { %s133_s10 = smov 120   ;;  %s134_s11 = smov 104   ;;  %vm3_vm0 = vcmask 64512   ;;  %vm9_vm1 = vcmask 1048512   ;;  %vm15_vm2 = vcmask 982912   ;;  %vm21_vm3 = vcmask 917312   ;;  %s209_s0 = inlined_call_operand.vmem [shape: f32[16,8], index: 0, kind: input, shape index: {}]   ;;  %s210_s1 = inlined_call_operand.vmem [shape: f32[1,128], index: 1, kind: output, shape index: {}]  }
   0x1   :  { %v103_v0 = vld [vmem:[%s209_s0 + $0xf] sm:$0x1]   ;;  %v105_v1 = vld [vmem:[%s209_s0 + $0xd] sm:$0x1]   ;;  %v104_v2 = vld [vmem:[%s209_s0 + $0xe] sm:$0x1]  }
   0x2   :  { %7 = vrot.lane.b32.xlu0 %v103_v0, %s133_s10  ;;  %19 = vrot.lane.b32.xlu1 %v105_v1, %s134_s11  ;;  %v106_v3 = vld [vmem:[%s209_s0 + $0xc] sm:$0x1]   ;;  %s135_s16 = smov 112   ;;  %s136_s17 = smov 96   ;;  %v107_v4 = vld [vmem:[%s209_s0 + $0xb] sm:$0x1]  }
   0x3   :  { %v108_v5 = vld [vmem:[%s209_s0 + $0xa] sm:$0x1]   ;;  %v2_v6 = vld [vmem:[%s209_s0] sm:$0x1]   ;;  %s137_s24 = smov 88   ;;  %s138_s25 = smov 80  }
   0x4   :  { %4 = vst.msk [vmem:[#allocation0] sm:$0x1] %vm3_vm0, %v2_v6   ;;  %v109_v7 = vld [vmem:[%s209_s0 + $0x9] sm:$0x1]   ;;  %v110_v8 = vld [vmem:[%s209_s0 + $0x8] sm:$0x1]  }
   0x5   :  { %s139_s30 = smov 72   ;;  %s140_s2 = smov 64   ;;  %v111_v9 = vld [vmem:[%s209_s0 + $0x7] sm:$0x1]   ;;  %v112_v10 = vld [vmem:[%s209_s0 + $0x6] sm:$0x1]  }
   0x6   :  { %13 = vrot.lane.b32.xlu0 %v104_v2, %s135_s16  ;;  %25 = vrot.lane.b32.xlu1 %v106_v3, %s136_s17  ;;  %s141_s7 = smov 56   ;;  %s142_s8 = smov 48   ;;  %v113_v11 = vld [vmem:[%s209_s0 + $0x5] sm:$0x1]   ;;  %v114_v12 = vld [vmem:[%s209_s0 + $0x4] sm:$0x1]  }
   0x7   :  { %s143_s13 = smov 40   ;;  %s144_s14 = smov 32   ;;  %v115_v13 = vld [vmem:[%s209_s0 + $0x3] sm:$0x1]   ;;  %v116_v14 = vld [vmem:[%s209_s0 + $0x2] sm:$0x1]  }
   0x8   :  { %s145_s19 = smov 24   ;;  %s146_s20 = smov 16   ;;  %v117_v15 = vld [vmem:[%s209_s0 + $0x1] sm:$0x1]   ;;  %vm27_vm4 = vcmask 851712   ;;  %vm33_vm5 = vcmask 786112  }
   0x9   :  { %s147_s0 = smov 8   ;;  %vm39_vm6 = vcmask 720512   ;;  %vm45_vm7 = vcmask 654912   ;;  %vm51_vm8 = vcmask 589312   ;;  %vm57_vm9 = vcmask 523712  }
   0xa   :  { %31 = vrot.lane.b32.xlu0 %v107_v4, %s137_s24  ;;  %37 = vrot.lane.b32.xlu1 %v108_v5, %s138_s25  ;;  %vm63_vm10 = vcmask 458112   ;;  %vm69_vm11 = vcmask 392512   ;;  %vm75_vm12 = vcmask 326912   ;;  %vm81_vm13 = vcmask 261312  }
   0xb   :  { %vm87_vm14 = vcmask 195712   ;;  %vm93_vm15 = vcmask 130112  }
   0xe   :  { %43 = vrot.lane.b32.xlu0 %v109_v7, %s139_s30  ;;  %49 = vrot.lane.b32.xlu1 %v110_v8, %s140_s2 }
  0x12   :  { %55 = vrot.lane.b32.xlu0 %v111_v9, %s141_s7  ;;  %61 = vrot.lane.b32.xlu1 %v112_v10, %s142_s8 }
  0x16   :  { %67 = vrot.lane.b32.xlu0 %v113_v11, %s143_s13  ;;  %73 = vrot.lane.b32.xlu1 %v114_v12, %s144_s14 }
  0x1a   :  { %79 = vrot.lane.b32.xlu0 %v115_v13, %s145_s19  ;;  %85 = vrot.lane.b32.xlu1 %v116_v14, %s146_s20 }
  0x1e   :  { %91 = vrot.lane.b32.xlu0 %v117_v15, %s147_s0 }
  0x74   :  { %v8_v16 = vpop.permute.xlu0 %7   ;;  %v20_v17 = vpop.permute.xlu1 %19  }
  0x75   :  { %10 = vst.msk [vmem:[#allocation0] sm:$0x1] %vm9_vm1, %v8_v16  }
  0x78   :  { %v14_v18 = vpop.permute.xlu0 %13   ;;  %v26_v19 = vpop.permute.xlu1 %25  }
  0x79   :  { %16 = vst.msk [vmem:[#allocation0] sm:$0x1] %vm15_vm2, %v14_v18  }
  0x7a   :  { %22 = vst.msk [vmem:[#allocation0] sm:$0x1] %vm21_vm3, %v20_v17  }
  0x7b   :  { %28 = vst.msk [vmem:[#allocation0] sm:$0x1] %vm27_vm4, %v26_v19  }
  0x7c   :  { %v32_v20 = vpop.permute.xlu0 %31   ;;  %v38_v21 = vpop.permute.xlu1 %37  }
  0x7d   :  { %34 = vst.msk [vmem:[#allocation0] sm:$0x1] %vm33_vm5, %v32_v20  }
  0x7e   :  { %40 = vst.msk [vmem:[#allocation0] sm:$0x1] %vm39_vm6, %v38_v21  }
  0x80   :  { %v44_v22 = vpop.permute.xlu0 %43   ;;  %v50_v23 = vpop.permute.xlu1 %49  }
  0x81   :  { %46 = vst.msk [vmem:[#allocation0] sm:$0x1] %vm45_vm7, %v44_v22  }
  0x82   :  { %52 = vst.msk [vmem:[#allocation0] sm:$0x1] %vm51_vm8, %v50_v23  }
  0x84   :  { %v56_v24 = vpop.permute.xlu0 %55   ;;  %v62_v25 = vpop.permute.xlu1 %61  }
  0x85   :  { %58 = vst.msk [vmem:[#allocation0] sm:$0x1] %vm57_vm9, %v56_v24  }
  0x86   :  { %64 = vst.msk [vmem:[#allocation0] sm:$0x1] %vm63_vm10, %v62_v25  }
  0x88   :  { %v68_v26 = vpop.permute.xlu0 %67   ;;  %v74_v27 = vpop.permute.xlu1 %73  }
  0x89   :  { %70 = vst.msk [vmem:[#allocation0] sm:$0x1] %vm69_vm11, %v68_v26  }
  0x8a   :  { %76 = vst.msk [vmem:[#allocation0] sm:$0x1] %vm75_vm12, %v74_v27  }
  0x8c   :  { %v80_v28 = vpop.permute.xlu0 %79   ;;  %v86_v29 = vpop.permute.xlu1 %85  }
  0x8d   :  { %82 = vst.msk [vmem:[#allocation0] sm:$0x1] %vm81_vm13, %v80_v28  }
  0x8e   :  { %88 = vst.msk [vmem:[#allocation0] sm:$0x1] %vm87_vm14, %v86_v29  }
  0x90   :  { %v92_v30 = vpop.permute.xlu0 %91  }
  0x91   :  { %94 = vst.msk [vmem:[#allocation0] sm:$0x1] %vm93_vm15, %v92_v30  }
  0x98   :  { %v99_v31 = vld [vmem:[#allocation0] sm:$0x1] }
  0x99   :  { %102 = vst [vmem:[%s210_s1] sm:$0x1] %v99_v31 }

// kernel: residual_block.1
= control target key start
LH: loop header
LB: loop body
LE: loop exit
PB: predicated region body
PF: predicated region fallthrough
CT: control target
= control target key end

     0   :  { %v41_v22 = vlaneseq  ;;  %vm106_vm0 = vcmask 1040384   ;;  %vm131_vm3 = vcmask 1046528   ;;  %vm1867_vm6 = vmmov 0   ;;  %s2572_s1 = inlined_call_operand.vmem [shape: f32[3,128,128], index: 1, kind: input, shape index: {}]   ;;  %s2573_s0 = inlined_call_operand.vmem [shape: f32[32,128], index: 0, kind: input, shape index: {}]   ;;  %s2574_s3 = inlined_call_operand.vmem [shape: f32[128,128], index: 3, kind: input, shape index: {}]   ;;  %s2575_s2 = inlined_call_operand.vmem [shape: f32[3,128,128], index: 2, kind: input, shape index: {}]   ;;  %s2576_s4 = inlined_call_operand.vmem [shape: f32[4,128], index: 4, kind: input, shape index: {}]   ;;  %s2577_s5 = inlined_call_operand.vmem [shape: f32[32,128], index: 5, kind: output, shape index: {}]  }
   0x1   :  { %v1243_v0 = vld [vmem:[%s2572_s1 + $0xf8] sm:$0xff]  ;;  %v1242_v2 = vld [vmem:[%s2572_s1 + $0xf0] sm:$0xff]  ;;  %v1241_v4 = vld [vmem:[%s2572_s1 + $0xe8] sm:$0xff] }
   0x2   :  { %v171_v1 = vld [vmem:[%s2572_s1 + $0x78] sm:$0xff]  ;;  %1488 = vmatprep.subr.mxu0 %v1243_v0  ;;  %v170_v3 = vld [vmem:[%s2572_s1 + $0x70] sm:$0xff]  ;;  %v169_v5 = vld [vmem:[%s2572_s1 + $0x68] sm:$0xff]  ;;  %v1976_v27 = vshrl.u32 %v41_v22, 7 }
   0x3   :  { %1526 = vmatprep.subr.mxu1 %v171_v1  ;;  %1489 = vmatpush3.msra.mxu0 %v1243_v0  ;;  %v1240_v6 = vld [vmem:[%s2572_s1 + $0xe0] sm:$0xff]  ;;  %v1239_v8 = vld [vmem:[%s2572_s1 + $0xd8] sm:$0xff]  ;;  %v1238_v10 = vld [vmem:[%s2572_s1 + $0xd0] sm:$0xff] }
   0x4   :  { %1527 = vmatpush3.msra.mxu1 %v171_v1  ;;  %1490 = vmatprep.subr.mxu0 %v1242_v2  ;;  %v168_v7 = vld [vmem:[%s2572_s1 + $0x60] sm:$0xff]  ;;  %v167_v9 = vld [vmem:[%s2572_s1 + $0x58] sm:$0xff]  ;;  %v166_v11 = vld [vmem:[%s2572_s1 + $0x50] sm:$0xff]  ;;  %v44_v32 = vadd.s32 16, %v1976_v27  ;;  %v50_v35 = vand.u32 15, %v1976_v27 }
   0x5   :  { %1528 = vmatprep.subr.mxu1 %v170_v3  ;;  %1491 = vmatpush3.msra.mxu0 %v1242_v2  ;;  %v1237_v12 = vld [vmem:[%s2572_s1 + $0xc8] sm:$0xff]  ;;  %v1236_v14 = vld [vmem:[%s2572_s1 + $0xc0] sm:$0xff]  ;;  %v1235_v16 = vld [vmem:[%s2572_s1 + $0xb8] sm:$0xff] }
   0x6   :  { %1529 = vmatpush3.msra.mxu1 %v170_v3  ;;  %1492 = vmatprep.subr.mxu0 %v1241_v4  ;;  %v165_v13 = vld [vmem:[%s2572_s1 + $0x48] sm:$0xff]  ;;  %v164_v15 = vld [vmem:[%s2572_s1 + $0x40] sm:$0xff]  ;;  %v163_v17 = vld [vmem:[%s2572_s1 + $0x38] sm:$0xff]  ;;  %v64_v43 = vand.u32 15, %v44_v32  ;;  %vm2018_vm1 = vcmp.ne.s32.totalorder %v50_v35, 0  ;;  %v43_v3 = vadd.s32 8, %v1976_v27 }
   0x7   :  { %1530 = vmatprep.subr.mxu1 %v169_v5  ;;  %1493 = vmatpush3.msra.mxu0 %v1241_v4  ;;  %v1234_v18 = vld [vmem:[%s2572_s1 + $0xb0] sm:$0xff]  ;;  %v1233_v20 = vld [vmem:[%s2572_s1 + $0xa8] sm:$0xff]  ;;  %v1232_v23 = vld [vmem:[%s2572_s1 + $0xa0] sm:$0xff] }
   0x8   :  { %1531 = vmatpush3.msra.mxu1 %v169_v5  ;;  %1494 = vmatprep.subr.mxu0 %v1240_v6  ;;  %v162_v19 = vld [vmem:[%s2572_s1 + $0x30] sm:$0xff]  ;;  %v161_v21 = vld [vmem:[%s2572_s1 + $0x28] sm:$0xff]  ;;  %v160_v24 = vld [vmem:[%s2572_s1 + $0x20] sm:$0xff]  ;;  %vm2030_vm2 = vcmp.ne.s32.totalorder %v64_v43, 0 }
   0x9   :  { %1532 = vmatprep.subr.mxu1 %v168_v7  ;;  %1495 = vmatpush3.msra.mxu0 %v1240_v6  ;;  %v1231_v25 = vld [vmem:[%s2572_s1 + $0x98] sm:$0xff]  ;;  %v20_v28 = vld [vmem:[%s2573_s0] sm:$0xff]  ;;  %v1230_v29 = vld [vmem:[%s2572_s1 + $0x90] sm:$0xff] }
   0xa   :  { %1533 = vmatpush3.msra.mxu1 %v168_v7  ;;  %1496 = vmatprep.subr.mxu0 %v1239_v8  ;;  %v159_v26 = vld [vmem:[%s2572_s1 + $0x18] sm:$0xff]  ;;  %v158_v30 = vld [vmem:[%s2572_s1 + $0x10] sm:$0xff]  ;;  %v1990_v31 = vld [vmem:[%s2573_s0 + $0x8] sm:$0xff]  ;;  %v107_v36 = vrot.slane %v20_v28, 7  ;;  %v132_v51 = vrot.slane %v20_v28, 1  ;;  %v57_v7 = vand.u32 15, %v43_v3 }
   0xb   :  { %1534 = vmatprep.subr.mxu1 %v167_v9  ;;  %1497 = vmatpush3.msra.mxu0 %v1239_v8  ;;  %v1229_v33 = vld [vmem:[%s2572_s1 + $0x88] sm:$0xff]  ;;  %v2003_v37 = vld [vmem:[%s2573_s0 + $0x10] sm:$0xff]  ;;  %v108_v38 = vrot.slane %v1990_v31, 7  ;;  %v1228_v39 = vld [vmem:[%s2572_s1 + $0x80] sm:$0xff]  ;;  %v133_v52 = vrot.slane %v1990_v31, 1  ;;  %v45_v8 = vadd.s32 24, %v1976_v27 }
   0xc   :  { %1535 = vmatpush3.msra.mxu1 %v167_v9  ;;  %1498 = vmatprep.subr.mxu0 %v1238_v10  ;;  %v157_v34 = vld [vmem:[%s2572_s1 + $0x8] sm:$0xff]  ;;  %v156_v40 = vld [vmem:[%s2572_s1] sm:$0xff]  ;;  %v2015_v41 = vld [vmem:[%s2573_s0 + $0x18] sm:$0xff]  ;;  %v110_v42 = vrot.slane %v2003_v37, 7  ;;  %v118_v45 = vsel %vm106_vm0, 0.0, %v107_v36  ;;  %v135_v5 = vrot.slane %v2003_v37, 1 }
   0xd   :  { %1536 = vmatprep.subr.mxu1 %v166_v11  ;;  %1499 = vmatpush3.msra.mxu0 %v1238_v10  ;;  %v109_v46 = vsel %vm106_vm0, %v107_v36, %v108_v38  ;;  %v112_v47 = vrot.slane %v2015_v41, 7  ;;  %v1261_v48 = vld [vmem:[%s2572_s1 + $0x178] sm:$0xff]  ;;  %v1260_v53 = vld [vmem:[%s2572_s1 + $0x170] sm:$0xff]  ;;  %v1259_v55 = vld [vmem:[%s2572_s1 + $0x168] sm:$0xff]  ;;  %v134_v56 = vsel %vm131_vm3, %v132_v51, %v133_v52  ;;  %v137_v9 = vrot.slane %v2015_v41, 1 }
   0xe   :  { %1537 = vmatpush3.msra.mxu1 %v166_v11  ;;  %1500 = vmatprep.subr.mxu0 %v1237_v12  ;;  %v111_v50 = vsel %vm106_vm0, %v108_v38, %v110_v42  ;;  %v1258_v57 = vld [vmem:[%s2572_s1 + $0x160] sm:$0xff]  ;;  %v1257_v58 = vld [vmem:[%s2572_s1 + $0x158] sm:$0xff]  ;;  %v1256_v59 = vld [vmem:[%s2572_s1 + $0x150] sm:$0xff]  ;;  %vm2094_vm4 = vcmp.ne.s32.totalorder %v57_v7, 15 }
   0xf   :  { %1538 = vmatprep.subr.mxu1 %v165_v13  ;;  %1501 = vmatpush3.msra.mxu0 %v1237_v12  ;;  %v113_v54 = vsel %vm106_vm0, %v110_v42, %v112_v47  ;;  %v1255_v60 = vld [vmem:[%s2572_s1 + $0x148] sm:$0xff]  ;;  %v1254_v61 = vld [vmem:[%s2572_s1 + $0x140] sm:$0xff]  ;;  %v1253_v62 = vld [vmem:[%s2572_s1 + $0x138] sm:$0xff]  ;;  %v136_v12 = vsel %vm131_vm3, %v133_v52, %v135_v5 }
  0x10   :  { %1539 = vmatpush3.msra.mxu1 %v165_v13  ;;  %1502 = vmatprep.subr.mxu0 %v1236_v14  ;;  %v1252_v63 = vld [vmem:[%s2572_s1 + $0x130] sm:$0xff]  ;;  %v1251_v0 = vld [vmem:[%s2572_s1 + $0x128] sm:$0xff]  ;;  %v1250_v1 = vld [vmem:[%s2572_s1 + $0x120] sm:$0xff]  ;;  %v71_v13 = vand.u32 15, %v45_v8 }
  0x11   :  { %1540 = vmatprep.subr.mxu1 %v164_v15  ;;  %1503 = vmatpush3.msra.mxu0 %v1236_v14  ;;  %v1249_v2 = vld [vmem:[%s2572_s1 + $0x118] sm:$0xff]  ;;  %v1248_v4 = vld [vmem:[%s2572_s1 + $0x110] sm:$0xff]  ;;  %v1247_v6 = vld [vmem:[%s2572_s1 + $0x108] sm:$0xff]  ;;  %v138_v14 = vsel %vm131_vm3, %v135_v5, %v137_v9 }
  0x12   :  { %1541 = vmatpush3.msra.mxu1 %v164_v15  ;;  %1504 = vmatprep.subr.mxu0 %v1235_v16  ;;  %v1246_v10 = vld [vmem:[%s2572_s1 + $0x100] sm:$0xff]  ;;  %vm2104_vm5 = vcmp.ne.s32.totalorder %v71_v13, 15  ;;  %v2151_v22 = vld [vmem:[%s2574_s3 + $0x58] sm:$0xff]  ;;  %v2232_v32 = vld [vmem:[%s2574_s3 + $0x10] sm:$0xff] }
  0x13   :  { %1542 = vmatprep.subr.mxu1 %v163_v17  ;;  %1505 = vmatpush3.msra.mxu0 %v1235_v16  ;;  %v143_v16 = vsel %vm131_vm3, %v137_v9, 0.0  ;;  %v1292_v49 = vld [vmem:[%s2575_s2 + $0x150] sm:$0xff] }
  0x14   :  { %1543 = vmatpush3.msra.mxu1 %v163_v17  ;;  %1506 = vmatprep.subr.mxu0 %v1234_v18  ;;  %v1866_v17 = vmov 0.0  }
  0x15   :  { %1544 = vmatprep.subr.mxu1 %v162_v19  ;;  %1507 = vmatpush3.msra.mxu0 %v1234_v18  ;;  %v2116_v18 = vld [vmem:[%s2574_s3 + $0x78] sm:$0xff] }
  0x16   :  { %1545 = vmatpush3.msra.mxu1 %v162_v19  ;;  %1508 = vmatprep.subr.mxu0 %v1233_v20  ;;  %v2122_v19 = vld [vmem:[%s2574_s3 + $0x70] sm:$0xff] }
  0x17   :  { %1546 = vmatprep.subr.mxu1 %v161_v21  ;;  %1509 = vmatpush3.msra.mxu0 %v1233_v20  ;;  %v2129_v20 = vld [vmem:[%s2574_s3 + $0x68] sm:$0xff] }
  0x18   :  { %1547 = vmatpush3.msra.mxu1 %v161_v21  ;;  %1510 = vmatprep.subr.mxu0 %v1232_v23  ;;  %v2143_v21 = vld [vmem:[%s2574_s3 + $0x60] sm:$0xff] }
  0x19   :  { %1548 = vmatprep.subr.mxu1 %v160_v24  ;;  %1511 = vmatpush3.msra.mxu0 %v1232_v23  ;;  %v2160_v23 = vld [vmem:[%s2574_s3 + $0x50] sm:$0xff] }
  0x1a   :  { %1549 = vmatpush3.msra.mxu1 %v160_v24  ;;  %1512 = vmatprep.subr.mxu0 %v1231_v25  ;;  %v2169_v24 = vld [vmem:[%s2574_s3 + $0x48] sm:$0xff] }
  0x1b   :  { %1550 = vmatprep.subr.mxu1 %v159_v26  ;;  %1513 = vmatpush3.msra.mxu0 %v1231_v25  ;;  %v2178_v25 = vld [vmem:[%s2574_s3 + $0x40] sm:$0xff] }
  0x1c   :  { %1551 = vmatpush3.msra.mxu1 %v159_v26  ;;  %1514 = vmatprep.subr.mxu0 %v1230_v29  ;;  %v2187_v26 = vld [vmem:[%s2574_s3 + $0x38] sm:$0xff] }
  0x1d   :  { %1552 = vmatprep.subr.mxu1 %v158_v30  ;;  %1515 = vmatpush3.msra.mxu0 %v1230_v29  ;;  %v2205_v29 = vld [vmem:[%s2574_s3 + $0x28] sm:$0xff] }
  0x1e   :  { %1553 = vmatpush3.msra.mxu1 %v158_v30  ;;  %1516 = vmatprep.subr.mxu0 %v1229_v33  ;;  %v2214_v30 = vld [vmem:[%s2574_s3 + $0x20] sm:$0xff] }
  0x1f   :  { %1554 = vmatprep.subr.mxu1 %v157_v34  ;;  %1517 = vmatpush3.msra.mxu0 %v1229_v33  ;;  %v2241_v33 = vld [vmem:[%s2574_s3 + $0x8] sm:$0xff] }
  0x20   :  { %1555 = vmatpush3.msra.mxu1 %v157_v34  ;;  %1518 = vmatprep.subr.mxu0 %v1228_v39  ;;  %v2246_v34 = vld [vmem:[%s2574_s3] sm:$0xff] }
  0x21   :  { %1556 = vmatprep.subr.mxu1 %v156_v40  ;;  %1519 = vmatpush3.msra.mxu0 %v1228_v39 }
  0x22   :  { %1520 = vmatprep.mubr.f32.mxu0 %v20_v28  ;;  %1557 = vmatpush3.msra.mxu1 %v156_v40  ;;  %v2196_v28 = vld [vmem:[%s2574_s3 + $0x30] sm:$0xff] }
  0x23   :  { %1558 = vmatprep.mubr.msk.f32.mxu1 %vm2018_vm1, %v118_v45  ;;  %1521 = vmatmul.mubr.f32.vlgmr.msra.gmra.mxu0 %v1990_v31  ;;  %v2223_v31 = vld [vmem:[%s2574_s3 + $0x18] sm:$0xff] }
  0x24   :  { %1559 = vmatmul.mubr.f32.vlgmr.msra.gmra.mxu1 %v109_v46  ;;  %1564 = vmatprep.subr.mxu0 %v1261_v48 }
  0x25   :  { %1523 = vmatprep.mubr.f32.mxu0 %v2003_v37  ;;  %1565 = vmatpush3.msra.mxu0 %v1261_v48 }
  0x26   :  { %1561 = vmatprep.mubr.msk.f32.mxu1 %vm2030_vm2, %v111_v50  ;;  %1566 = vmatprep.subr.mxu0 %v1260_v53 }
  0x27   :  { %1567 = vmatpush3.msra.mxu0 %v1260_v53  ;;  %1602 = vmatprep.subr.mxu1 %v1866_v17 }
  0x28   :  { %1562 = vmatmul.mubr.f32.gmra.mxu1 %v113_v54  ;;  %1568 = vmatprep.subr.mxu0 %v1259_v55 }
  0x29   :  { %1524 = vmatmul.mubr.f32.gmra.mxu0 %v2015_v41  ;;  %1603 = vmatpush3.msra.mxu1 %v2116_v18 }
  0x2a   :  { %1569 = vmatpush3.msra.mxu0 %v1259_v55  ;;  %1596 = vmatprep.mubr.f32.mxu0 %v134_v56 }
  0x2b   :  { %1570 = vmatprep.subr.mxu0 %v1258_v57  ;;  %1604 = vmatprep.subr.mxu1 %v1866_v17 }
  0x2c   :  { %1571 = vmatpush3.msra.mxu0 %v1258_v57  ;;  %1605 = vmatpush3.msra.mxu1 %v2122_v19 }
  0x2d   :  { %1572 = vmatprep.subr.mxu0 %v1257_v58  ;;  %1606 = vmatprep.subr.mxu1 %v1866_v17 }
  0x2e   :  { %1573 = vmatpush3.msra.mxu0 %v1257_v58  ;;  %1607 = vmatpush3.msra.mxu1 %v2129_v20 }
  0x2f   :  { %1574 = vmatprep.subr.mxu0 %v1256_v59  ;;  %1608 = vmatprep.subr.mxu1 %v1866_v17 }
  0x30   :  { %1575 = vmatpush3.msra.mxu0 %v1256_v59  ;;  %1609 = vmatpush3.msra.mxu1 %v2143_v21 }
  0x31   :  { %1576 = vmatprep.subr.mxu0 %v1255_v60  ;;  %1610 = vmatprep.subr.mxu1 %v1866_v17 }
  0x32   :  { %1577 = vmatpush3.msra.mxu0 %v1255_v60  ;;  %1611 = vmatpush3.msra.mxu1 %v2151_v22 }
  0x33   :  { %1578 = vmatprep.subr.mxu0 %v1254_v61  ;;  %1612 = vmatprep.subr.mxu1 %v1866_v17 }
  0x34   :  { %1579 = vmatpush3.msra.mxu0 %v1254_v61  ;;  %1613 = vmatpush3.msra.mxu1 %v2160_v23 }
  0x35   :  { %1580 = vmatprep.subr.mxu0 %v1253_v62  ;;  %1614 = vmatprep.subr.mxu1 %v1866_v17 }
  0x36   :  { %1581 = vmatpush3.msra.mxu0 %v1253_v62  ;;  %1615 = vmatpush3.msra.mxu1 %v2169_v24 }
  0x37   :  { %1582 = vmatprep.subr.mxu0 %v1252_v63  ;;  %1616 = vmatprep.subr.mxu1 %v1866_v17 }
  0x38   :  { %1583 = vmatpush3.msra.mxu0 %v1252_v63  ;;  %1617 = vmatpush3.msra.mxu1 %v2178_v25 }
  0x39   :  { %1584 = vmatprep.subr.mxu0 %v1251_v0  ;;  %1618 = vmatprep.subr.mxu1 %v1866_v17 }
  0x3a   :  { %1585 = vmatpush3.msra.mxu0 %v1251_v0  ;;  %1619 = vmatpush3.msra.mxu1 %v2187_v26 }
  0x3b   :  { %1586 = vmatprep.subr.mxu0 %v1250_v1  ;;  %1620 = vmatprep.subr.mxu1 %v1866_v17 }
  0x3c   :  { %1587 = vmatpush3.msra.mxu0 %v1250_v1  ;;  %1621 = vmatpush3.msra.mxu1 %v2196_v28 }
  0x3d   :  { %1588 = vmatprep.subr.mxu0 %v1249_v2  ;;  %1622 = vmatprep.subr.mxu1 %v1866_v17 }
  0x3e   :  { %1589 = vmatpush3.msra.mxu0 %v1249_v2  ;;  %1623 = vmatpush3.msra.mxu1 %v2205_v29  ;;  %v2272_v2 = vsub.s32 0, %v1976_v27 }
  0x3f   :  { %1590 = vmatprep.subr.mxu0 %v1248_v4  ;;  %1624 = vmatprep.subr.mxu1 %v1866_v17 }
  0x40   :  { %1591 = vmatpush3.msra.mxu0 %v1248_v4  ;;  %1625 = vmatpush3.msra.mxu1 %v2214_v30 }
  0x41   :  { %1592 = vmatprep.subr.mxu0 %v1247_v6  ;;  %1626 = vmatprep.subr.mxu1 %v1866_v17 }
  0x42   :  { %1593 = vmatpush3.msra.mxu0 %v1247_v6  ;;  %1627 = vmatpush3.msra.mxu1 %v2223_v31 }
  0x43   :  { %1594 = vmatprep.subr.mxu0 %v1246_v10  ;;  %1628 = vmatprep.subr.mxu1 %v1866_v17 }
  0x44   :  { %1595 = vmatpush3.msra.mxu0 %v1246_v10  ;;  %1629 = vmatpush3.msra.mxu1 %v2232_v32 }
  0x45   :  { %1597 = vmatmul.mubr.msk.f32.vlgmr.msra.gmra.mxu0 %vm2094_vm4, %v136_v12  ;;  %1637 = vmatprep.subr.mxu0 %v1866_v17 }
  0x46   :  { %1599 = vmatprep.mubr.f32.mxu0 %v138_v14  ;;  %1638 = vmatpush3.msra.mxu0 %v2116_v18 }
  0x47   :  { %1639 = vmatprep.subr.mxu0 %v1866_v17  ;;  %1630 = vmatprep.subr.mxu1 %v1866_v17 }
  0x48   :  { %1640 = vmatpush3.msra.mxu0 %v2122_v19  ;;  %1631 = vmatpush3.msra.mxu1 %v2241_v33 }
  0x49   :  { %1600 = vmatmul.mubr.msk.f32.gmra.mxu0 %vm2104_vm5, %v143_v16  ;;  %1641 = vmatprep.subr.mxu0 %v1866_v17 }
  0x4a   :  { %1642 = vmatpush3.msra.mxu0 %v2129_v20  ;;  %1634 = vmatprep.mubr.msk.f32.mxu1 %vm1867_vm6, %v1866_v17 }
  0x4b   :  { %1643 = vmatprep.subr.mxu0 %v1866_v17  ;;  %1632 = vmatprep.subr.mxu1 %v1866_v17 }
  0x4c   :  { %1644 = vmatpush3.msra.mxu0 %v2143_v21  ;;  %1633 = vmatpush3.msra.mxu1 %v2246_v34 }
  0x4d   :  { %1645 = vmatprep.subr.mxu0 %v1866_v17  ;;  %1669 = vmatprep.mubr.msk.f32.mxu0 %vm1867_vm6, %v1866_v17 }
  0x4e   :  { %1646 = vmatpush3.msra.mxu0 %v2151_v22 }
  0x4f   :  { %1647 = vmatprep.subr.mxu0 %v1866_v17 }
  0x50   :  { %1648 = vmatpush3.msra.mxu0 %v2160_v23 }
  0x51   :  { %1649 = vmatprep.subr.mxu0 %v1866_v17 }
  0x52   :  { %1650 = vmatpush3.msra.mxu0 %v2169_v24 }
  0x53   :  { %1651 = vmatprep.subr.mxu0 %v1866_v17 }
  0x54   :  { %1652 = vmatpush3.msra.mxu0 %v2178_v25 }
  0x55   :  { %1653 = vmatprep.subr.mxu0 %v1866_v17 }
  0x56   :  { %1654 = vmatpush3.msra.mxu0 %v2187_v26 }
  0x57   :  { %1655 = vmatprep.subr.mxu0 %v1866_v17 }
  0x58   :  { %1656 = vmatpush3.msra.mxu0 %v2196_v28 }
  0x59   :  { %1657 = vmatprep.subr.mxu0 %v1866_v17 }
  0x5a   :  { %1658 = vmatpush3.msra.mxu0 %v2205_v29 }
  0x5b   :  { %1659 = vmatprep.subr.mxu0 %v1866_v17 }
  0x5c   :  { %1660 = vmatpush3.msra.mxu0 %v2214_v30 }
  0x5d   :  { %1661 = vmatprep.subr.mxu0 %v1866_v17 }
  0x5e   :  { %1662 = vmatpush3.msra.mxu0 %v2223_v31 }
  0x5f   :  { %1663 = vmatprep.subr.mxu0 %v1866_v17 }
  0x60   :  { %1664 = vmatpush3.msra.mxu0 %v2232_v32 }
  0x61   :  { %1665 = vmatprep.subr.mxu0 %v1866_v17 }
  0x62   :  { %1666 = vmatpush3.msra.mxu0 %v2241_v33 }
  0x63   :  { %1667 = vmatprep.subr.mxu0 %v1866_v17 }
  0x64   :  { %1668 = vmatpush3.msra.mxu0 %v2246_v34 }
  0xe3   :  { %v1522_v35 = vpop.f32.mrf.mxu0 }
  0xe4   :  { %v1560_v36 = vpop.f32.mrf.mxu1 }
  0xe5   :  { %v255_v37 = vpop.f32.mrf.mxu0  ;;  %v346_v47 = vadd.f32 %v1560_v36, %v1522_v35 }
  0xe6   :  { %v340_v39 = vpop.f32.mrf.mxu1 }
  0xe7   :  { %v341_v43 = vadd.f32 %v340_v39, %v255_v37 }
  0xe8   :  { %v1563_v40 = vpop.f32.mrf.mxu1 }
  0xe9   :  { %v1525_v38 = vpop.f32.mrf.mxu0 }
  0xea   :  { %v350_v45 = vpop.f32.mrf.mxu1  ;;  %v356_v54 = vadd.f32 %v1563_v40, %v1525_v38 }
  0xeb   :  { %v265_v41 = vpop.f32.mrf.mxu0 }
  0xec   :  { %v351_v51 = vadd.f32 %v350_v45, %v265_v41  ;;  %v1279_v45 = vld [vmem:[%s2575_s2 + $0xf8] sm:$0xff] }
  0xed   :  { %1672 = vmatprep.subr.mxu1 %v1279_v45 }
 0x105   :  { %v1598_v42 = vpop.f32.mrf.mxu0 }
 0x106   :  { %v2261_v52 = vadd.f32 %v1598_v42, %v346_v47  ;;  %v1277_v47 = vld [vmem:[%s2575_s2 + $0xe8] sm:$0xff] }
 0x107   :  { %v442_v46 = vpop.f32.mrf.mxu0 }
 0x108   :  { %v2259_v48 = vadd.f32 %v442_v46, %v341_v43  ;;  %v1278_v46 = vld [vmem:[%s2575_s2 + $0xf0] sm:$0xff] }
 0x109   :  { %v1601_v50 = vpop.f32.mrf.mxu0 }
 0x10a   :  { %v465_v55 = vadd.f32 %v2261_v52, %v2259_v48  ;;  %v2267_v57 = vadd.f32 %v1601_v50, %v356_v54  ;;  %v716_v50 = vld [vmem:[%s2575_s2 + $0x78] sm:$0xff] }
 0x10b   :  { %v452_v53 = vpop.f32.mrf.mxu0  ;;  %1710 = vmatprep.subr.mxu0 %v716_v50  ;;  %v1275_v54 = vld [vmem:[%s2575_s2 + $0xd8] sm:$0xff] }
 0x10c   :  { %v2265_v56 = vadd.f32 %v452_v53, %v351_v51  ;;  %v1276_v51 = vld [vmem:[%s2575_s2 + $0xe0] sm:$0xff]  ;;  %v715_v53 = vld [vmem:[%s2575_s2 + $0x70] sm:$0xff] }
 0x10e   :  { %v466_v58 = vadd.f32 %v465_v55, %v2265_v56  ;;  %v714_v55 = vld [vmem:[%s2575_s2 + $0x68] sm:$0xff] }
 0x110   :  { %v467_v59 = vadd.f32 %v466_v58, %v2267_v57  ;;  %v1274_v58 = vld [vmem:[%s2575_s2 + $0xd0] sm:$0xff] }
 0x112   :  { %v468_v60 = vrot.slane %v467_v59, 4 }
 0x114   :  { %v469_v61 = vadd.f32 %v468_v60, %v467_v59  ;;  %v713_v59 = vld [vmem:[%s2575_s2 + $0x60] sm:$0xff]  ;;  %v1273_v60 = vld [vmem:[%s2575_s2 + $0xc8] sm:$0xff] }
 0x116   :  { %v470_v62 = vrot.slane %v469_v61, 2 }
 0x118   :  { %v471_v63 = vadd.f32 %v470_v62, %v469_v61  ;;  %v712_v61 = vld [vmem:[%s2575_s2 + $0x58] sm:$0xff]  ;;  %v1272_v62 = vld [vmem:[%s2575_s2 + $0xc0] sm:$0xff] }
 0x11a   :  { %v472_v0 = vrot.slane %v471_v63, 1 }
 0x11c   :  { %v473_v1 = vadd.f32 %v472_v0, %v471_v63  ;;  %v711_v63 = vld [vmem:[%s2575_s2 + $0x50] sm:$0xff]  ;;  %v1271_v0 = vld [vmem:[%s2575_s2 + $0xb8] sm:$0xff] }
 0x11e   :  { %1635 = vmatmul.mubr.f32.vlgmr.msra.gmra.mxu1 %v473_v1  ;;  %v710_v1 = vld [vmem:[%s2575_s2 + $0x48] sm:$0xff] }
 0x11f   :  { %1673 = vmatpush3.msra.mxu1 %v1279_v45 }
 0x120   :  { %1674 = vmatprep.subr.mxu1 %v1278_v46 }
 0x121   :  { %1675 = vmatpush3.msra.mxu1 %v1278_v46  ;;  %v2385_v46 = vld [vmem:[%s2576_s4] sm:$0xf] }
 0x122   :  { %1676 = vmatprep.subr.mxu1 %v1277_v47 }
 0x123   :  { %1677 = vmatpush3.msra.mxu1 %v1277_v47 }
 0x124   :  { %1678 = vmatprep.subr.mxu1 %v1276_v51 }
 0x125   :  { %1679 = vmatpush3.msra.mxu1 %v1276_v51 }
 0x126   :  { %1680 = vmatprep.subr.mxu1 %v1275_v54 }
 0x127   :  { %1681 = vmatpush3.msra.mxu1 %v1275_v54 }
 0x128   :  { %1682 = vmatprep.subr.mxu1 %v1274_v58 }
 0x129   :  { %1683 = vmatpush3.msra.mxu1 %v1274_v58 }
 0x12a   :  { %1684 = vmatprep.subr.mxu1 %v1273_v60 }
 0x12b   :  { %1685 = vmatpush3.msra.mxu1 %v1273_v60 }
 0x12c   :  { %1686 = vmatprep.subr.mxu1 %v1272_v62 }
 0x12d   :  { %1687 = vmatpush3.msra.mxu1 %v1272_v62 }
 0x12e   :  { %1688 = vmatprep.subr.mxu1 %v1271_v0 }
 0x12f   :  { %1689 = vmatpush3.msra.mxu1 %v1271_v0 }
 0x1de   :  { %v540_v3 = vpop.f32.mrf.mxu1 }
 0x1df   :  { %v2274_v4 = vmul.f32 0.001953125, %v540_v3  ;;  %v1270_v3 = vld [vmem:[%s2575_s2 + $0xb0] sm:$0xff] }
 0x1e0   :  { %v1636_v5 = vpop.f32.mrf.mxu1  ;;  %1690 = vmatprep.subr.mxu1 %v1270_v3 }
 0x1e1   :  { %v548_v6 = vrot.slane %v2274_v4, %v2272_v2  ;;  %v709_v5 = vld [vmem:[%s2575_s2 + $0x40] sm:$0xff]  ;;  %1691 = vmatpush3.msra.mxu1 %v1270_v3 }
 0x1e3   :  { %v549_v7 = vsub.f32 %v2259_v48, %v548_v6  ;;  %v550_v8 = vsub.f32 %v2261_v52, %v548_v6  ;;  %v551_v9 = vsub.f32 %v2265_v56, %v548_v6  ;;  %v552_v10 = vsub.f32 %v2267_v57, %v548_v6  ;;  %v1269_v6 = vld [vmem:[%s2575_s2 + $0xa8] sm:$0xff] }
 0x1e4   :  { %1692 = vmatprep.subr.mxu1 %v1269_v6 }
 0x1e5   :  { %v553_v12 = vmul.f32 %v549_v7, %v549_v7  ;;  %v554_v13 = vmul.f32 %v550_v8, %v550_v8  ;;  %v555_v14 = vmul.f32 %v551_v9, %v551_v9  ;;  %v556_v35 = vmul.f32 %v552_v10, %v552_v10  ;;  %v708_v7 = vld [vmem:[%s2575_s2 + $0x38] sm:$0xff]  ;;  %v1268_v8 = vld [vmem:[%s2575_s2 + $0xa0] sm:$0xff]  ;;  %v707_v9 = vld [vmem:[%s2575_s2 + $0x30] sm:$0xff]  ;;  %1693 = vmatpush3.msra.mxu1 %v1269_v6 }
 0x1e6   :  { %v1267_v10 = vld [vmem:[%s2575_s2 + $0x98] sm:$0xff]  ;;  %1694 = vmatprep.subr.mxu1 %v1268_v8 }
 0x1e7   :  { %v557_v16 = vadd.f32 %v554_v13, %v553_v12  ;;  %v706_v12 = vld [vmem:[%s2575_s2 + $0x28] sm:$0xff]  ;;  %1695 = vmatpush3.msra.mxu1 %v1268_v8  ;;  %v1266_v13 = vld [vmem:[%s2575_s2 + $0x90] sm:$0xff] }
 0x1e8   :  { %1696 = vmatprep.subr.mxu1 %v1267_v10 }
 0x1e9   :  { %v558_v36 = vadd.f32 %v557_v16, %v555_v14  ;;  %v705_v14 = vld [vmem:[%s2575_s2 + $0x20] sm:$0xff]  ;;  %1697 = vmatpush3.msra.mxu1 %v1267_v10  ;;  %v1265_v16 = vld [vmem:[%s2575_s2 + $0x88] sm:$0xff] }
 0x1ea   :  { %1698 = vmatprep.subr.mxu1 %v1266_v13 }
 0x1eb   :  { %v559_v37 = vadd.f32 %v558_v36, %v556_v35  ;;  %v704_v35 = vld [vmem:[%s2575_s2 + $0x18] sm:$0xff]  ;;  %1699 = vmatpush3.msra.mxu1 %v1266_v13  ;;  %v1264_v36 = vld [vmem:[%s2575_s2 + $0x80] sm:$0xff] }
 0x1ec   :  { %1700 = vmatprep.subr.mxu1 %v1265_v16 }
 0x1ed   :  { %v560_v38 = vrot.slane %v559_v37, 4  ;;  %1701 = vmatpush3.msra.mxu1 %v1265_v16 }
 0x1ee   :  { %1702 = vmatprep.subr.mxu1 %v1264_v36 }
 0x1ef   :  { %v561_v39 = vadd.f32 %v560_v38, %v559_v37  ;;  %v703_v37 = vld [vmem:[%s2575_s2 + $0x10] sm:$0xff]  ;;  %1703 = vmatpush3.msra.mxu1 %v1264_v36  ;;  %v702_v38 = vld [vmem:[%s2575_s2 + $0x8] sm:$0xff] }
 0x1f1   :  { %v562_v40 = vrot.slane %v561_v39, 2 }
 0x1f3   :  { %v563_v41 = vadd.f32 %v562_v40, %v561_v39  ;;  %v1297_v39 = vld [vmem:[%s2575_s2 + $0x178] sm:$0xff]  ;;  %v701_v40 = vld [vmem:[%s2575_s2] sm:$0xff] }
 0x1f4   :  { %1748 = vmatprep.subr.mxu1 %v1297_v39 }
 0x1f5   :  { %v564_v42 = vrot.slane %v563_v41, 1 }
 0x1f7   :  { %v565_v43 = vadd.f32 %v564_v42, %v563_v41 }
 0x1f9   :  { %1670 = vmatmul.mubr.f32.vlgmr.msra.gmra.mxu0 %v565_v43 }
 0x1fa   :  { %1711 = vmatpush3.msra.mxu0 %v716_v50 }
 0x1fb   :  { %1712 = vmatprep.subr.mxu0 %v715_v53 }
 0x1fc   :  { %1713 = vmatpush3.msra.mxu0 %v715_v53 }
 0x1fd   :  { %1714 = vmatprep.subr.mxu0 %v714_v55 }
 0x1fe   :  { %1715 = vmatpush3.msra.mxu0 %v714_v55  ;;  %v655_v55 = vsub.s32 1, %v1976_v27 }
 0x1ff   :  { %1716 = vmatprep.subr.mxu0 %v713_v59 }
 0x200   :  { %1717 = vmatpush3.msra.mxu0 %v713_v59 }
 0x201   :  { %1718 = vmatprep.subr.mxu0 %v712_v61 }
 0x202   :  { %1719 = vmatpush3.msra.mxu0 %v712_v61 }
 0x203   :  { %1720 = vmatprep.subr.mxu0 %v711_v63 }
 0x204   :  { %1721 = vmatpush3.msra.mxu0 %v711_v63 }
 0x205   :  { %1722 = vmatprep.subr.mxu0 %v710_v1 }
 0x206   :  { %1723 = vmatpush3.msra.mxu0 %v710_v1 }
 0x207   :  { %1724 = vmatprep.subr.mxu0 %v709_v5 }
 0x208   :  { %1725 = vmatpush3.msra.mxu0 %v709_v5 }
 0x209   :  { %1726 = vmatprep.subr.mxu0 %v708_v7 }
 0x20a   :  { %1727 = vmatpush3.msra.mxu0 %v708_v7 }
 0x20b   :  { %1728 = vmatprep.subr.mxu0 %v707_v9 }
 0x20c   :  { %1729 = vmatpush3.msra.mxu0 %v707_v9 }
 0x20d   :  { %1730 = vmatprep.subr.mxu0 %v706_v12 }
 0x20e   :  { %1731 = vmatpush3.msra.mxu0 %v706_v12  ;;  %v1295_v12 = vld [vmem:[%s2575_s2 + $0x168] sm:$0xff] }
 0x20f   :  { %1732 = vmatprep.subr.mxu0 %v705_v14 }
 0x210   :  { %1733 = vmatpush3.msra.mxu0 %v705_v14 }
 0x211   :  { %1734 = vmatprep.subr.mxu0 %v704_v35 }
 0x212   :  { %1735 = vmatpush3.msra.mxu0 %v704_v35  ;;  %v1294_v35 = vld [vmem:[%s2575_s2 + $0x160] sm:$0xff] }
 0x213   :  { %1736 = vmatprep.subr.mxu0 %v703_v37 }
 0x214   :  { %1737 = vmatpush3.msra.mxu0 %v703_v37  ;;  %v1293_v37 = vld [vmem:[%s2575_s2 + $0x158] sm:$0xff] }
 0x215   :  { %1738 = vmatprep.subr.mxu0 %v702_v38 }
 0x216   :  { %1739 = vmatpush3.msra.mxu0 %v702_v38 }
 0x217   :  { %1740 = vmatprep.subr.mxu0 %v701_v40 }
 0x218   :  { %1741 = vmatpush3.msra.mxu0 %v701_v40  ;;  %v1290_v40 = vld [vmem:[%s2575_s2 + $0x140] sm:$0xff] }
 0x219   :  { %1786 = vmatprep.subr.mxu0 %v1866_v17 }
 0x2b9   :  { %v632_v41 = vpop.f32.mrf.mxu0 }
 0x2ba   :  { %v636_v42 = vmul.f32 0.001953125, %v632_v41  ;;  %v1289_v41 = vld [vmem:[%s2575_s2 + $0x138] sm:$0xff] }
 0x2bb   :  { %v1671_v43 = vpop.f32.mrf.mxu0 }
 0x2bc   :  { %v637_v45 = vadd.f32 1e-05, %v636_v42  ;;  %v1288_v42 = vld [vmem:[%s2575_s2 + $0x130] sm:$0xff]  ;;  %v1287_v43 = vld [vmem:[%s2575_s2 + $0x128] sm:$0xff] }
 0x2be   :  { %1858 = vrsqrt.f32 %v637_v45  ;;  %v1286_v45 = vld [vmem:[%s2575_s2 + $0x120] sm:$0xff] }
 0x2cb   :  { %v1859_v47 = vpop.eup %1858 }
 0x2cc   :  { %v639_v50 = vmul.f32 %v1859_v47, %v2385_v46  ;;  %v1285_v47 = vld [vmem:[%s2575_s2 + $0x118] sm:$0xff] }
 0x2ce   :  { %v640_v51 = vmul.f32 %v639_v50, %v2274_v4  ;;  %v648_v53 = vrot.slane %v639_v50, %v2272_v2  ;;  %v1284_v50 = vld [vmem:[%s2575_s2 + $0x110] sm:$0xff] }
 0x2d0   :  { %v642_v54 = vrot.slane %v640_v51, 7  ;;  %v649_v59 = vmul.f32 %v648_v53, %v2259_v48  ;;  %v650_v61 = vmul.f32 %v648_v53, %v2261_v52  ;;  %v651_v62 = vmul.f32 %v648_v53, %v2265_v56  ;;  %v1296_v48 = vld [vmem:[%s2575_s2 + $0x170] sm:$0xff]  ;;  %v1283_v51 = vld [vmem:[%s2575_s2 + $0x108] sm:$0xff] }
 0x2d1   :  { %v652_v63 = vmul.f32 %v648_v53, %v2267_v57 }
 0x2d2   :  { %v644_v58 = vsub.f32 %v2385_v46, %v642_v54  ;;  %v1282_v54 = vld [vmem:[%s2575_s2 + $0x100] sm:$0xff] }
 0x2d4   :  { %v656_v60 = vrot.slane %v644_v58, %v655_v55 }
 0x2d6   :  { %v657_v0 = vadd.f32 %v656_v60, %v649_v59  ;;  %v658_v1 = vadd.f32 %v656_v60, %v650_v61  ;;  %v659_v3 = vadd.f32 %v656_v60, %v651_v62  ;;  %v660_v4 = vadd.f32 %v656_v60, %v652_v63 }
 0x2d8   :  { %v661_v5 = vmax.f32 %v657_v0, 0.0  ;;  %v2396_v6 = vmax.f32 %v658_v1, 0.0  ;;  %v2398_v7 = vmax.f32 %v659_v3, 0.0  ;;  %v2400_v8 = vmax.f32 %v660_v4, 0.0 }
 0x2da   :  { %1704 = vmatprep.mubr.f32.mxu1 %v661_v5  ;;  %v669_v52 = vrot.slane %v661_v5, 7  ;;  %v670_v56 = vrot.slane %v2396_v6, 7  ;;  %v672_v57 = vrot.slane %v2398_v7, 7  ;;  %v685_v13 = vrot.slane %v661_v5, 1 }
 0x2db   :  { %1705 = vmatmul.mubr.f32.vlgmr.msra.gmra.mxu1 %v2396_v6  ;;  %v686_v14 = vrot.slane %v2396_v6, 1  ;;  %v674_v16 = vrot.slane %v2400_v8, 7  ;;  %v688_v53 = vrot.slane %v2398_v7, 1  ;;  %v690_v55 = vrot.slane %v2400_v8, 1 }
 0x2dc   :  { %1749 = vmatpush3.msra.mxu1 %v1297_v39  ;;  %1707 = vmatprep.mubr.f32.mxu1 %v2398_v7  ;;  %v680_v9 = vsel %vm106_vm0, 0.0, %v669_v52  ;;  %v671_v10 = vsel %vm106_vm0, %v669_v52, %v670_v56  ;;  %v673_v36 = vsel %vm106_vm0, %v670_v56, %v672_v57  ;;  %v1291_v39 = vld [vmem:[%s2575_s2 + $0x148] sm:$0xff] }
 0x2dd   :  { %1750 = vmatprep.subr.mxu1 %v1296_v48  ;;  %1742 = vmatprep.mubr.msk.f32.mxu0 %vm2018_vm1, %v680_v9  ;;  %v687_v44 = vsel %vm131_vm3, %v685_v13, %v686_v14  ;;  %v675_v38 = vsel %vm106_vm0, %v672_v57, %v674_v16  ;;  %v689_v58 = vsel %vm131_vm3, %v686_v14, %v688_v53  ;;  %v696_v60 = vsel %vm131_vm3, %v690_v55, 0.0 }
 0x2de   :  { %1751 = vmatpush3.msra.mxu1 %v1296_v48  ;;  %1743 = vmatmul.mubr.f32.vlgmr.msra.gmra.mxu0 %v671_v10  ;;  %v691_v59 = vsel %vm131_vm3, %v688_v53, %v690_v55 }
 0x2df   :  { %1752 = vmatprep.subr.mxu1 %v1295_v12  ;;  %1708 = vmatmul.mubr.f32.gmra.mxu1 %v2400_v8 }
 0x2e0   :  { %1745 = vmatprep.mubr.msk.f32.mxu0 %vm2030_vm2, %v673_v36  ;;  %1753 = vmatpush3.msra.mxu1 %v1295_v12 }
 0x2e1   :  { %1754 = vmatprep.subr.mxu1 %v1294_v35  ;;  %1780 = vmatprep.mubr.f32.mxu1 %v687_v44 }
 0x2e2   :  { %1755 = vmatpush3.msra.mxu1 %v1294_v35  ;;  %1746 = vmatmul.mubr.f32.gmra.mxu0 %v675_v38 }
 0x2e3   :  { %1756 = vmatprep.subr.mxu1 %v1293_v37  ;;  %1787 = vmatpush3.msra.mxu0 %v2116_v18 }
 0x2e4   :  { %1757 = vmatpush3.msra.mxu1 %v1293_v37  ;;  %1788 = vmatprep.subr.mxu0 %v1866_v17 }
 0x2e5   :  { %1758 = vmatprep.subr.mxu1 %v1292_v49  ;;  %1789 = vmatpush3.msra.mxu0 %v2122_v19 }
 0x2e6   :  { %1759 = vmatpush3.msra.mxu1 %v1292_v49  ;;  %1790 = vmatprep.subr.mxu0 %v1866_v17 }
 0x2e7   :  { %1760 = vmatprep.subr.mxu1 %v1291_v39  ;;  %1791 = vmatpush3.msra.mxu0 %v2129_v20 }
 0x2e8   :  { %1761 = vmatpush3.msra.mxu1 %v1291_v39  ;;  %1792 = vmatprep.subr.mxu0 %v1866_v17 }
 0x2e9   :  { %1762 = vmatprep.subr.mxu1 %v1290_v40  ;;  %1793 = vmatpush3.msra.mxu0 %v2143_v21 }
 0x2ea   :  { %1763 = vmatpush3.msra.mxu1 %v1290_v40  ;;  %1794 = vmatprep.subr.mxu0 %v1866_v17 }
 0x2eb   :  { %1764 = vmatprep.subr.mxu1 %v1289_v41  ;;  %1795 = vmatpush3.msra.mxu0 %v2151_v22 }
 0x2ec   :  { %1765 = vmatpush3.msra.mxu1 %v1289_v41  ;;  %1796 = vmatprep.subr.mxu0 %v1866_v17 }
 0x2ed   :  { %1766 = vmatprep.subr.mxu1 %v1288_v42  ;;  %1797 = vmatpush3.msra.mxu0 %v2160_v23 }
 0x2ee   :  { %1767 = vmatpush3.msra.mxu1 %v1288_v42  ;;  %1798 = vmatprep.subr.mxu0 %v1866_v17 }
 0x2ef   :  { %1768 = vmatprep.subr.mxu1 %v1287_v43  ;;  %1799 = vmatpush3.msra.mxu0 %v2169_v24 }
 0x2f0   :  { %1769 = vmatpush3.msra.mxu1 %v1287_v43  ;;  %1800 = vmatprep.subr.mxu0 %v1866_v17 }
 0x2f1   :  { %1770 = vmatprep.subr.mxu1 %v1286_v45  ;;  %1801 = vmatpush3.msra.mxu0 %v2178_v25 }
 0x2f2   :  { %1771 = vmatpush3.msra.mxu1 %v1286_v45  ;;  %1802 = vmatprep.subr.mxu0 %v1866_v17 }
 0x2f3   :  { %1772 = vmatprep.subr.mxu1 %v1285_v47  ;;  %1803 = vmatpush3.msra.mxu0 %v2187_v26 }
 0x2f4   :  { %1773 = vmatpush3.msra.mxu1 %v1285_v47  ;;  %1804 = vmatprep.subr.mxu0 %v1866_v17 }
 0x2f5   :  { %1774 = vmatprep.subr.mxu1 %v1284_v50  ;;  %1805 = vmatpush3.msra.mxu0 %v2196_v28 }
 0x2f6   :  { %1775 = vmatpush3.msra.mxu1 %v1284_v50  ;;  %1806 = vmatprep.subr.mxu0 %v1866_v17 }
 0x2f7   :  { %1776 = vmatprep.subr.mxu1 %v1283_v51  ;;  %1807 = vmatpush3.msra.mxu0 %v2205_v29 }
 0x2f8   :  { %1777 = vmatpush3.msra.mxu1 %v1283_v51  ;;  %1808 = vmatprep.subr.mxu0 %v1866_v17 }
 0x2f9   :  { %1778 = vmatprep.subr.mxu1 %v1282_v54  ;;  %1809 = vmatpush3.msra.mxu0 %v2214_v30 }
 0x2fa   :  { %1779 = vmatpush3.msra.mxu1 %v1282_v54  ;;  %1810 = vmatprep.subr.mxu0 %v1866_v17  ;;  %v1198_v54 = vsub.s32 2, %v1976_v27 }
 0x2fb   :  { %1781 = vmatmul.mubr.msk.f32.vlgmr.msra.gmra.mxu1 %vm2094_vm4, %v689_v58  ;;  %1811 = vmatpush3.msra.mxu0 %v2223_v31 }
 0x2fc   :  { %1783 = vmatprep.mubr.f32.mxu1 %v691_v59  ;;  %1812 = vmatprep.subr.mxu0 %v1866_v17 }
 0x2fd   :  { %1813 = vmatpush3.msra.mxu0 %v2232_v32  ;;  %1818 = vmatprep.mubr.msk.f32.mxu0 %vm1867_vm6, %v1866_v17 }
 0x2fe   :  { %1814 = vmatprep.subr.mxu0 %v1866_v17  ;;  %1821 = vmatprep.subr.mxu1 %v1866_v17 }
 0x2ff   :  { %1784 = vmatmul.mubr.msk.f32.gmra.mxu1 %vm2104_vm5, %v696_v60  ;;  %1815 = vmatpush3.msra.mxu0 %v2241_v33 }
 0x300   :  { %1816 = vmatprep.subr.mxu0 %v1866_v17  ;;  %1822 = vmatpush3.msra.mxu1 %v2116_v18 }
 0x301   :  { %1817 = vmatpush3.msra.mxu0 %v2246_v34  ;;  %1823 = vmatprep.subr.mxu1 %v1866_v17 }
 0x302   :  { %1824 = vmatpush3.msra.mxu1 %v2122_v19  ;;  %1853 = vmatprep.mubr.msk.f32.mxu1 %vm1867_vm6, %v1866_v17 }
 0x303   :  { %1825 = vmatprep.subr.mxu1 %v1866_v17 }
 0x304   :  { %1826 = vmatpush3.msra.mxu1 %v2129_v20 }
 0x305   :  { %1827 = vmatprep.subr.mxu1 %v1866_v17 }
 0x306   :  { %1828 = vmatpush3.msra.mxu1 %v2143_v21 }
 0x307   :  { %1829 = vmatprep.subr.mxu1 %v1866_v17 }
 0x308   :  { %1830 = vmatpush3.msra.mxu1 %v2151_v22 }
 0x309   :  { %1831 = vmatprep.subr.mxu1 %v1866_v17 }
 0x30a   :  { %1832 = vmatpush3.msra.mxu1 %v2160_v23 }
 0x30b   :  { %1833 = vmatprep.subr.mxu1 %v1866_v17 }
 0x30c   :  { %1834 = vmatpush3.msra.mxu1 %v2169_v24 }
 0x30d   :  { %1835 = vmatprep.subr.mxu1 %v1866_v17 }
 0x30e   :  { %1836 = vmatpush3.msra.mxu1 %v2178_v25 }
 0x30f   :  { %1837 = vmatprep.subr.mxu1 %v1866_v17 }
 0x310   :  { %1838 = vmatpush3.msra.mxu1 %v2187_v26 }
 0x311   :  { %1839 = vmatprep.subr.mxu1 %v1866_v17 }
 0x312   :  { %1840 = vmatpush3.msra.mxu1 %v2196_v28 }
 0x313   :  { %1841 = vmatprep.subr.mxu1 %v1866_v17 }
 0x314   :  { %1842 = vmatpush3.msra.mxu1 %v2205_v29 }
 0x315   :  { %1843 = vmatprep.subr.mxu1 %v1866_v17 }
 0x316   :  { %1844 = vmatpush3.msra.mxu1 %v2214_v30 }
 0x317   :  { %1845 = vmatprep.subr.mxu1 %v1866_v17 }
 0x318   :  { %1846 = vmatpush3.msra.mxu1 %v2223_v31 }
 0x319   :  { %1847 = vmatprep.subr.mxu1 %v1866_v17 }
 0x31a   :  { %1848 = vmatpush3.msra.mxu1 %v2232_v32 }
 0x31b   :  { %1849 = vmatprep.subr.mxu1 %v1866_v17 }
 0x31c   :  { %1850 = vmatpush3.msra.mxu1 %v2241_v33 }
 0x31d   :  { %1851 = vmatprep.subr.mxu1 %v1866_v17 }
 0x31e   :  { %1852 = vmatpush3.msra.mxu1 %v2246_v34 }
 0x39b   :  { %v1706_v11 = vpop.f32.mrf.mxu1 }
 0x39d   :  { %v800_v15 = vpop.f32.mrf.mxu1 }
 0x39e   :  { %v1744_v18 = vpop.f32.mrf.mxu0 }
 0x39f   :  { %v1709_v19 = vpop.f32.mrf.mxu1  ;;  %v891_v28 = vadd.f32 %v1744_v18, %v1706_v11  ;;  %v1206_v11 = vsub.s32 3, %v1976_v27  ;;  %v1863_v27 = vld [vmem:[%s2573_s0 + $0x8] sm:$0xff] }
 0x3a0   :  { %v885_v20 = vpop.f32.mrf.mxu0 }
 0x3a1   :  { %v810_v21 = vpop.f32.mrf.mxu1  ;;  %v886_v24 = vadd.f32 %v885_v20, %v800_v15 }
 0x3a2   :  { %v1747_v22 = vpop.f32.mrf.mxu0 }
 0x3a3   :  { %v901_v17 = vadd.f32 %v1747_v22, %v1709_v19 }
 0x3a4   :  { %v895_v25 = vpop.f32.mrf.mxu0 }
 0x3a5   :  { %v896_v31 = vadd.f32 %v895_v25, %v810_v21 }
 0x3bb   :  { %v1782_v23 = vpop.f32.mrf.mxu1 }
 0x3bc   :  { %v1007_v32 = vadd.f32 %v1782_v23, %v891_v28  ;;  %v1862_v28 = vld [vmem:[%s2573_s0] sm:$0xff] }
 0x3bd   :  { %v987_v26 = vpop.f32.mrf.mxu1 }
 0x3be   :  { %v1006_v29 = vadd.f32 %v987_v26, %v886_v24 }
 0x3bf   :  { %v1785_v30 = vpop.f32.mrf.mxu1 }
 0x3c0   :  { %v1010_v61 = vadd.f32 %v1007_v32, %v1006_v29  ;;  %v1009_v62 = vadd.f32 %v1785_v30, %v901_v17 }
 0x3c1   :  { %v997_v33 = vpop.f32.mrf.mxu1 }
 0x3c2   :  { %v1008_v34 = vadd.f32 %v997_v33, %v896_v31 }
 0x3c4   :  { %v1011_v63 = vadd.f32 %v1010_v61, %v1008_v34 }
 0x3c6   :  { %v1012_v0 = vadd.f32 %v1011_v63, %v1009_v62 }
 0x3c8   :  { %v1013_v1 = vrot.slane %v1012_v0, 4 }
 0x3ca   :  { %v1014_v3 = vadd.f32 %v1013_v1, %v1012_v0 }
 0x3cc   :  { %v1015_v4 = vrot.slane %v1014_v3, 2 }
 0x3ce   :  { %v1016_v5 = vadd.f32 %v1015_v4, %v1014_v3 }
 0x3d0   :  { %v1017_v6 = vrot.slane %v1016_v5, 1 }
 0x3d2   :  { %v1018_v7 = vadd.f32 %v1017_v6, %v1016_v5 }
 0x3d4   :  { %1819 = vmatmul.mubr.f32.vlgmr.msra.gmra.mxu0 %v1018_v7 }
 0x494   :  { %v1085_v8 = vpop.f32.mrf.mxu0 }
 0x495   :  { %v1089_v48 = vmul.f32 0.001953125, %v1085_v8 }
 0x496   :  { %v1820_v52 = vpop.f32.mrf.mxu0 }
 0x497   :  { %v1093_v56 = vrot.slane %v1089_v48, %v2272_v2 }
 0x499   :  { %v1094_v57 = vsub.f32 %v1006_v29, %v1093_v56  ;;  %v1095_v9 = vsub.f32 %v1007_v32, %v1093_v56  ;;  %v1096_v10 = vsub.f32 %v1008_v34, %v1093_v56  ;;  %v1097_v12 = vsub.f32 %v1009_v62, %v1093_v56 }
 0x49b   :  { %v1098_v13 = vmul.f32 %v1094_v57, %v1094_v57  ;;  %v1099_v14 = vmul.f32 %v1095_v9, %v1095_v9  ;;  %v1100_v16 = vmul.f32 %v1096_v10, %v1096_v10  ;;  %v1101_v36 = vmul.f32 %v1097_v12, %v1097_v12 }
 0x49d   :  { %v1102_v35 = vadd.f32 %v1099_v14, %v1098_v13 }
 0x49f   :  { %v1103_v44 = vadd.f32 %v1102_v35, %v1100_v16 }
 0x4a1   :  { %v1104_v37 = vadd.f32 %v1103_v44, %v1101_v36 }
 0x4a3   :  { %v1105_v38 = vrot.slane %v1104_v37, 4 }
 0x4a5   :  { %v1106_v49 = vadd.f32 %v1105_v38, %v1104_v37 }
 0x4a7   :  { %v1107_v39 = vrot.slane %v1106_v49, 2 }
 0x4a9   :  { %v1108_v40 = vadd.f32 %v1107_v39, %v1106_v49 }
 0x4ab   :  { %v1109_v41 = vrot.slane %v1108_v40, 1 }
 0x4ad   :  { %v1110_v42 = vadd.f32 %v1109_v41, %v1108_v40 }
 0x4af   :  { %1854 = vmatmul.mubr.f32.vlgmr.msra.gmra.mxu1 %v1110_v42 }
 0x56f   :  { %v1177_v43 = vpop.f32.mrf.mxu1 }
 0x570   :  { %v1181_v2 = vmul.f32 0.001953125, %v1177_v43 }
 0x571   :  { %v1855_v45 = vpop.f32.mrf.mxu1 }
 0x572   :  { %v1182_v47 = vadd.f32 1e-05, %v1181_v2 }
 0x574   :  { %1860 = vrsqrt.f32 %v1182_v47 }
 0x581   :  { %v1861_v50 = vpop.eup %1860 }
 0x582   :  { %v1185_v51 = vrot.slane %v1861_v50, 6 }
 0x584   :  { %v1187_v53 = vmul.f32 %v1185_v51, %v2385_v46 }
 0x586   :  { %v1189_v55 = vrot.slane %v1187_v53, 2  ;;  %v1199_v59 = vrot.slane %v1187_v53, %v1198_v54 }
 0x588   :  { %v1191_v58 = vmul.f32 %v1189_v55, %v1089_v48  ;;  %v1200_v18 = vmul.f32 %v1199_v59, %v1006_v29  ;;  %v1201_v19 = vmul.f32 %v1199_v59, %v1007_v32  ;;  %v1202_v20 = vmul.f32 %v1199_v59, %v1008_v34  ;;  %v1865_v32 = vld [vmem:[%s2573_s0 + $0x18] sm:$0xff] }
 0x589   :  { %v1203_v21 = vmul.f32 %v1199_v59, %v1009_v62 }
 0x58a   :  { %v1193_v60 = vrot.slane %v1191_v58, 5 }
 0x58c   :  { %v1195_v15 = vsub.f32 %v2385_v46, %v1193_v60  ;;  %v1864_v46 = vld [vmem:[%s2573_s0 + $0x10] sm:$0xff] }
 0x58e   :  { %v1207_v22 = vrot.slane %v1195_v15, %v1206_v11 }
 0x590   :  { %v1208_v23 = vadd.f32 %v1207_v22, %v1200_v18  ;;  %v1209_v24 = vadd.f32 %v1207_v22, %v1201_v19  ;;  %v1210_v25 = vadd.f32 %v1207_v22, %v1202_v20  ;;  %v1211_v26 = vadd.f32 %v1207_v22, %v1203_v21 }
 0x592   :  { %v1212_v30 = vadd.f32 %v1862_v28, %v1208_v23  ;;  %v1213_v31 = vadd.f32 %v1863_v27, %v1209_v24  ;;  %v1214_v29 = vadd.f32 %v1864_v46, %v1210_v25  ;;  %v1215_v33 = vadd.f32 %v1865_v32, %v1211_v26 }
 0x594   :  { %v1216_v17 = vmax.f32 %v1212_v30, 0.0  ;;  %v1217_v61 = vmax.f32 %v1213_v31, 0.0  ;;  %v1218_v34 = vmax.f32 %v1214_v29, 0.0  ;;  %v1219_v62 = vmax.f32 %v1215_v33, 0.0 }
 0x596   :  { %1220 = vst [vmem:[%s2577_s5] sm:$0xff] %v1216_v17  ;;  %1221 = vst [vmem:[%s2577_s5 + $0x8] sm:$0xff] %v1217_v61 }
 0x597   :  { %1222 = vst [vmem:[%s2577_s5 + $0x10] sm:$0xff] %v1218_v34  ;;  %1223 = vst [vmem:[%s2577_s5 + $0x18] sm:$0xff] %v1219_v62 }

</bundles_post_ra>
